<compile_context>
chip_gen: v7x
topology: tpu7x:2x2x1
jax: 0.10.0
libtpu: 0.0.40
codegen_flags: <defaults>
</compile_context>

<pallas_src>
import math
import functools

import jax
import jax.numpy as jnp
from jax.experimental import pallas as pl
from jax.experimental.pallas import tpu as pltpu


NEG_INF = -1e30


# ---------------------------------------------------------------------------
# in-kernel helpers
# ---------------------------------------------------------------------------
def _layernorm(x, gamma, beta, eps=1e-5):
    mu = jnp.mean(x, axis=-1, keepdims=True)
    var = jnp.mean((x - mu) ** 2, axis=-1, keepdims=True)
    return (x - mu) * jax.lax.rsqrt(var + eps) * gamma + beta


def _gelu_tanh(x):
    # TODO(synk): PyTorch F.gelu defaults to the exact erf form; the tanh
    # approximation is used because erf is not guaranteed to lower in Mosaic.
    c = math.sqrt(2.0 / math.pi)
    return 0.5 * x * (1.0 + jnp.tanh(c * (x + 0.044715 * x * x * x)))


def _softmax_lastdim(s):
    m = jnp.max(s, axis=-1, keepdims=True)
    e = jnp.exp(s - m)
    return e * pl.reciprocal(jnp.sum(e, axis=-1, keepdims=True), approx=True)


# ---------------------------------------------------------------------------
# fused Stockformer kernel: one grid step = (batch b, encoder layer l)
# ---------------------------------------------------------------------------
def stockformer_kernel(x_ref, wtok_ref, pos_ref,
                       wq_ref, bq_ref, wk_ref, bk_ref, wv_ref, bv_ref,
                       wo_ref, bo_ref, w1_ref, b1_ref, w2_ref, b2_ref,
                       g1_ref, be1_ref, g2_ref, be2_ref,
                       gn_ref, bn_ref, wp_ref, bp_ref,
                       out_ref, h_ref, *, n_heads):
    L, D = h_ref.shape
    dk = D // n_heads
    scale = 1.0 / math.sqrt(dk)          # FullAttention scale = 1/sqrt(d_k)
    layer = pl.program_id(1)
    n_layers = pl.num_programs(1)

    row = jax.lax.broadcasted_iota(jnp.int32, (L, L), 0)
    col = jax.lax.broadcasted_iota(jnp.int32, (L, L), 1)

    # --- DataEmbedding (only at layer 0): circular conv1d(k=3) + sinusoid ---
    @pl.when(layer == 0)
    def _embed():
        xb = x_ref[0]                                         # (L, C) f32
        # circular +-1 sequence shifts as permutation matmuls (relayout-free)
        prev_p = ((col == row - 1) | ((row == 0) & (col == L - 1))
                  ).astype(jnp.float32)                       # xp[t] = x[t-1]
        next_p = ((col == row + 1) | ((row == L - 1) & (col == 0))
                  ).astype(jnp.float32)                       # xn[t] = x[t+1]
        xp = jnp.dot(prev_p, xb, preferred_element_type=jnp.float32)
        xn = jnp.dot(next_p, xb, preferred_element_type=jnp.float32)
        h_ref[...] = (
            jnp.dot(xp, wtok_ref[0], preferred_element_type=jnp.float32)
            + jnp.dot(xb, wtok_ref[1], preferred_element_type=jnp.float32)
            + jnp.dot(xn, wtok_ref[2], preferred_element_type=jnp.float32)
            + pos_ref[...])

    # --- one encoder layer ---
    h = h_ref[...]                                            # (L, D) f32
    hb = h.astype(jnp.bfloat16)
    causal = row >= col                                       # in-kernel mask

    acc = jnp.zeros((L, D), jnp.float32)                      # attn out (pre-bias)
    for hh in range(n_heads):                                 # heads unrolled
        qh = (jnp.dot(hb, wq_ref[0, hh], preferred_element_type=jnp.float32)
              + bq_ref[0, hh]) * scale
        kh = (jnp.dot(hb, wk_ref[0, hh], preferred_element_type=jnp.float32)
              + bk_ref[0, hh])
        vh = (jnp.dot(hb, wv_ref[0, hh], preferred_element_type=jnp.float32)
              + bv_ref[0, hh])
        s = jax.lax.dot_general(qh.astype(jnp.bfloat16), kh.astype(jnp.bfloat16),
                                (((1,), (1,)), ((), ())),
                                preferred_element_type=jnp.float32)   # (L, L)
        s = jnp.where(causal, s, NEG_INF)
        a = _softmax_lastdim(s)
        hd = jnp.dot(a.astype(jnp.bfloat16), vh.astype(jnp.bfloat16),
                     preferred_element_type=jnp.float32)      # (L, dk)
        # fold this head straight into the output projection (head-major wo)
        acc = acc + jnp.dot(hd.astype(jnp.bfloat16), wo_ref[0, hh],
                            preferred_element_type=jnp.float32)

    attn = acc + bo_ref[0]
    h = _layernorm(h + attn, g1_ref[0], be1_ref[0])

    # position-wise FFN (Conv1d kernel_size=1 == per-timestep Linear)
    ff = _gelu_tanh(jnp.dot(h.astype(jnp.bfloat16), w1_ref[0],
                            preferred_element_type=jnp.float32) + b1_ref[0])
    ff = jnp.dot(ff.astype(jnp.bfloat16), w2_ref[0],
                 preferred_element_type=jnp.float32) + b2_ref[0]
    h = _layernorm(h + ff, g2_ref[0], be2_ref[0])
    h_ref[...] = h

    # --- final encoder LayerNorm + projection decoder + last_bar slice ---
    @pl.when(layer == n_layers - 1)
    def _final():
        h_last = _layernorm(h[L - 1:L, :], gn_ref[...], bn_ref[...])   # (1, D)
        out_ref[0] = (jnp.dot(h_last, wp_ref[...],
                              preferred_element_type=jnp.float32)
                      + bp_ref[...])                                   # (1, c_out)


# ---------------------------------------------------------------------------
# wrapper
# ---------------------------------------------------------------------------
def stockformer_forward(x, p, n_heads, e_layers):
    B, L, C = x.shape
    D = p["wq"].shape[-1]
    dk = D // n_heads
    d_ff = p["w1"].shape[-1]
    c_out = p["wp"].shape[-1]

    # head-major Q/K/V weights: split OUTPUT features -> (E, H, D, dk)
    def head_cols(w):
        return w.reshape(e_layers, D, n_heads, dk).transpose(0, 2, 1, 3)

    # head-major output projection: split INPUT features -> (E, H, dk, D)
    def head_rows(w):
        return w.reshape(e_layers, n_heads, dk, D)

    def head_bias(b):
        return b.reshape(e_layers, 1, n_heads, dk).transpose(0, 2, 1, 3)

    inputs = [x, p["wtok"], p["pos"],
              head_cols(p["wq"]), head_bias(p["bq"]),
              head_cols(p["wk"]), head_bias(p["bk"]),
              head_cols(p["wv"]), head_bias(p["bv"]),
              head_rows(p["wo"]), p["bo"],
              p["w1"], p["b1"], p["w2"], p["b2"],
              p["g1"], p["be1"], p["g2"], p["be2"],
              p["gn"], p["bn"], p["wp"], p["bp"]]

    def full(shape):            # whole array resident, grid-invariant
        return pl.BlockSpec(shape, lambda b, l: (0,) * len(shape))

    def per_layer(shape):       # streamed along the layer grid axis
        return pl.BlockSpec((1,) + shape, lambda b, l: (l,) + (0,) * len(shape))

    in_specs = [
        pl.BlockSpec((1, L, C), lambda b, l: (b, 0, 0)),            # x
        full((3, C, D)),                                            # wtok
        full((L, D)),                                               # pos
        per_layer((n_heads, D, dk)), per_layer((n_heads, 1, dk)),   # wq, bq
        per_layer((n_heads, D, dk)), per_layer((n_heads, 1, dk)),   # wk, bk
        per_layer((n_heads, D, dk)), per_layer((n_heads, 1, dk)),   # wv, bv
        per_layer((n_heads, dk, D)), per_layer((1, D)),             # wo, bo
        per_layer((D, d_ff)), per_layer((1, d_ff)),                 # w1, b1
        per_layer((d_ff, D)), per_layer((1, D)),                    # w2, b2
        per_layer((1, D)), per_layer((1, D)),                       # g1, be1
        per_layer((1, D)), per_layer((1, D)),                       # g2, be2
        full((1, D)), full((1, D)),                                 # gn, bn
        full((D, c_out)), full((1, c_out)),                         # wp, bp
    ]

    kernel = functools.partial(stockformer_kernel, n_heads=n_heads)
    out = pl.pallas_call(
        kernel,
        out_shape=jax.ShapeDtypeStruct((B, 1, c_out), jnp.float32),
        grid=(B, e_layers),
        in_specs=in_specs,
        out_specs=pl.BlockSpec((1, 1, c_out), lambda b, l: (b, 0, 0)),
        scratch_shapes=[pltpu.VMEM((L, D), jnp.float32)],   # hidden state h
        compiler_params=pltpu.CompilerParams(
            dimension_semantics=("parallel", "arbitrary")),
    )(*inputs)
    return out[:, 0, :]


# ---------------------------------------------------------------------------
# deterministic parameter construction (synthetic init, no checkpoints)
# ---------------------------------------------------------------------------
def init_params(key, enc_in, c_out, d_model, e_layers, seq_len):
    d_ff = d_model * 2
    ks = jax.random.split(key, 16)
    w32 = lambda k, shp: jax.random.normal(k, shp, jnp.float32) * 0.05
    # big matmul weights stored in bf16 (f32 accumulation inside the kernel)
    w16 = lambda k, shp: (jax.random.normal(k, shp, jnp.float32) * 0.05
                          ).astype(jnp.bfloat16)
    p = dict(
        wtok=w32(ks[0], (3, enc_in, d_model)),             # Conv1d taps
        wq=w16(ks[1], (e_layers, d_model, d_model)), bq=w32(ks[2], (e_layers, 1, d_model)),
        wk=w16(ks[3], (e_layers, d_model, d_model)), bk=w32(ks[4], (e_layers, 1, d_model)),
        wv=w16(ks[5], (e_layers, d_model, d_model)), bv=w32(ks[6], (e_layers, 1, d_model)),
        wo=w16(ks[7], (e_layers, d_model, d_model)), bo=w32(ks[8], (e_layers, 1, d_model)),
        w1=w16(ks[9], (e_layers, d_model, d_ff)),    b1=w32(ks[10], (e_layers, 1, d_ff)),
        w2=w16(ks[11], (e_layers, d_ff, d_model)),   b2=w32(ks[12], (e_layers, 1, d_model)),
        g1=jnp.ones((e_layers, 1, d_model), jnp.float32),
        be1=jnp.zeros((e_layers, 1, d_model), jnp.float32),
        g2=jnp.ones((e_layers, 1, d_model), jnp.float32),
        be2=jnp.zeros((e_layers, 1, d_model), jnp.float32),
        gn=jnp.ones((1, d_model), jnp.float32),
        bn=jnp.zeros((1, d_model), jnp.float32),
        wp=w32(ks[13], (d_model, c_out)),
        bp=w32(ks[14], (1, c_out)),
    )
    # Informer sinusoidal PositionalEmbedding
    pos = jnp.arange(seq_len, dtype=jnp.float32)[:, None]
    div = jnp.exp(jnp.arange(0, d_model, 2, dtype=jnp.float32)
                  * (-math.log(10000.0) / d_model))
    pe = jnp.zeros((seq_len, d_model), jnp.float32)
    pe = pe.at[:, 0::2].set(jnp.sin(pos * div))
    pe = pe.at[:, 1::2].set(jnp.cos(pos * div))
    p["pos"] = pe
    return p


# ---------------------------------------------------------------------------
# pure-JAX reference (same math, full f32) for a sanity check
# ---------------------------------------------------------------------------
def stockformer_reference(x, p, n_heads, e_layers):
    B, L, _ = x.shape
    D = p["wq"].shape[-1]
    dk = D // n_heads
    scale = 1.0 / math.sqrt(dk)
    f32 = lambda a: a.astype(jnp.float32)
    xp_, xn_ = jnp.roll(x, 1, axis=1), jnp.roll(x, -1, axis=1)

    def ln(z, g, b, eps=1e-5):
        mu = z.mean(-1, keepdims=True)
        var = ((z - mu) ** 2).mean(-1, keepdims=True)
        return (z - mu) / jnp.sqrt(var + eps) * g + b

    causal = jnp.tril(jnp.ones((L, L), dtype=bool))
    mask = jnp.where(causal, 0.0, NEG_INF)       # generate_square_subsequent_mask

    h = (jnp.einsum("blc,cd->bld", xp_, p["wtok"][0])
         + jnp.einsum("blc,cd->bld", x, p["wtok"][1])
         + jnp.einsum("blc,cd->bld", xn_, p["wtok"][2]) + p["pos"][None])
    for l in range(e_layers):
        q = (h @ f32(p["wq"][l]) + p["bq"][l]).reshape(B, L, n_heads, dk)
        k = (h @ f32(p["wk"][l]) + p["bk"][l]).reshape(B, L, n_heads, dk)
        v = (h @ f32(p["wv"][l]) + p["bv"][l]).reshape(B, L, n_heads, dk)
        s = jnp.einsum("blhe,bshe->bhls", q, k) + mask[None, None]
        a = jax.nn.softmax(scale * s, axis=-1)
        o = jnp.einsum("bhls,bshe->blhe", a, v).reshape(B, L, D)
        o = o @ f32(p["wo"][l]) + p["bo"][l]
        h = ln(h + o, p["g1"][l], p["be1"][l])
        ff = _gelu_tanh(h @ f32(p["w1"][l]) + p["b1"][l])
        ff = ff @ f32(p["w2"][l]) + p["b2"][l]
        h = ln(h + ff, p["g2"][l], p["be2"][l])
    h = ln(h, p["gn"], p["bn"])
    out = h @ p["wp"] + p["bp"]
    return out[:, -1, :]                                   # last_bar=True


# ---------------------------------------------------------------------------
if __name__ == "__main__":
    B, SEQ, ENC_IN, C_OUT = 2, 8, 4, 4
    D_MODEL, N_HEADS, E_LAYERS = 32, 4, 2

    key = jax.random.PRNGKey(0)
    kx, kp = jax.random.split(key)
    x_enc = jax.random.normal(kx, (B, SEQ, ENC_IN), jnp.float32)
    params = init_params(kp, ENC_IN, C_OUT, D_MODEL, E_LAYERS, SEQ)

    out = stockformer_forward(x_enc, params, N_HEADS, E_LAYERS)
    out = jax.block_until_ready(out)
    assert out.shape == (B, C_OUT), out.shape

    ref = stockformer_reference(x_enc, params, N_HEADS, E_LAYERS)
    # tolerance accounts for bf16 MXU operands in the kernel vs f32 reference
    if not jnp.allclose(out, ref, atol=2e-2, rtol=2e-2):
        raise AssertionError(f"kernel/ref mismatch:\n{out}\n{ref}")

    print("KERNEL_OK")
</pallas_src>

<mosaic_0001>
module attributes {stable_mosaic.version = 11 : i64} {
  func.func @stockformer_kernel(%arg0: i32, %arg1: i32, %arg2: memref<1x8x4xf32, #tpu.memory_space<vmem>>, %arg3: memref<3x4x32xf32, #tpu.memory_space<vmem>>, %arg4: memref<8x32xf32, #tpu.memory_space<vmem>>, %arg5: memref<1x4x32x8xbf16, #tpu.memory_space<vmem>>, %arg6: memref<1x4x1x8xf32, #tpu.memory_space<vmem>>, %arg7: memref<1x4x32x8xbf16, #tpu.memory_space<vmem>>, %arg8: memref<1x4x1x8xf32, #tpu.memory_space<vmem>>, %arg9: memref<1x4x32x8xbf16, #tpu.memory_space<vmem>>, %arg10: memref<1x4x1x8xf32, #tpu.memory_space<vmem>>, %arg11: memref<1x4x8x32xbf16, #tpu.memory_space<vmem>>, %arg12: memref<1x1x32xf32, #tpu.memory_space<vmem>>, %arg13: memref<1x32x64xbf16, #tpu.memory_space<vmem>>, %arg14: memref<1x1x64xf32, #tpu.memory_space<vmem>>, %arg15: memref<1x64x32xbf16, #tpu.memory_space<vmem>>, %arg16: memref<1x1x32xf32, #tpu.memory_space<vmem>>, %arg17: memref<1x1x32xf32, #tpu.memory_space<vmem>>, %arg18: memref<1x1x32xf32, #tpu.memory_space<vmem>>, %arg19: memref<1x1x32xf32, #tpu.memory_space<vmem>>, %arg20: memref<1x1x32xf32, #tpu.memory_space<vmem>>, %arg21: memref<1x32xf32, #tpu.memory_space<vmem>>, %arg22: memref<1x32xf32, #tpu.memory_space<vmem>>, %arg23: memref<32x4xf32, #tpu.memory_space<vmem>>, %arg24: memref<1x4xf32, #tpu.memory_space<vmem>>, %arg25: memref<1x1x4xf32, #tpu.memory_space<vmem>>, %arg26: memref<8x32xf32, #tpu.memory_space<vmem>>) attributes {dimension_semantics = [#tpu.dimension_semantics<parallel>, #tpu.dimension_semantics<arbitrary>], iteration_bounds = array<i64: 2, 2>, scalar_prefetch = 0 : i64, scratch_operands = 1 : i64, tpu.core_type = #tpu.core_type<tc>, window_params = [{transform_indices = @transform_0, window_bounds = array<i64: 1, 8, 4>}, {pipeline_mode = #tpu.pipeline_mode<synchronous>, transform_indices = @transform_1, window_bounds = array<i64: 3, 4, 32>}, {pipeline_mode = #tpu.pipeline_mode<synchronous>, transform_indices = @transform_2, window_bounds = array<i64: 8, 32>}, {transform_indices = @transform_3, window_bounds = array<i64: 1, 4, 32, 8>}, {transform_indices = @transform_4, window_bounds = array<i64: 1, 4, 1, 8>}, {transform_indices = @transform_5, window_bounds = array<i64: 1, 4, 32, 8>}, {transform_indices = @transform_6, window_bounds = array<i64: 1, 4, 1, 8>}, {transform_indices = @transform_7, window_bounds = array<i64: 1, 4, 32, 8>}, {transform_indices = @transform_8, window_bounds = array<i64: 1, 4, 1, 8>}, {transform_indices = @transform_9, window_bounds = array<i64: 1, 4, 8, 32>}, {transform_indices = @transform_10, window_bounds = array<i64: 1, 1, 32>}, {transform_indices = @transform_11, window_bounds = array<i64: 1, 32, 64>}, {transform_indices = @transform_12, window_bounds = array<i64: 1, 1, 64>}, {transform_indices = @transform_13, window_bounds = array<i64: 1, 64, 32>}, {transform_indices = @transform_14, window_bounds = array<i64: 1, 1, 32>}, {transform_indices = @transform_15, window_bounds = array<i64: 1, 1, 32>}, {transform_indices = @transform_16, window_bounds = array<i64: 1, 1, 32>}, {transform_indices = @transform_17, window_bounds = array<i64: 1, 1, 32>}, {transform_indices = @transform_18, window_bounds = array<i64: 1, 1, 32>}, {pipeline_mode = #tpu.pipeline_mode<synchronous>, transform_indices = @transform_19, window_bounds = array<i64: 1, 32>}, {pipeline_mode = #tpu.pipeline_mode<synchronous>, transform_indices = @transform_20, window_bounds = array<i64: 1, 32>}, {pipeline_mode = #tpu.pipeline_mode<synchronous>, transform_indices = @transform_21, window_bounds = array<i64: 32, 4>}, {pipeline_mode = #tpu.pipeline_mode<synchronous>, transform_indices = @transform_22, window_bounds = array<i64: 1, 4>}, {transform_indices = @transform_23, window_bounds = array<i64: 1, 1, 4>}]} {
    %0 = tpu.iota {dimensions = array<i32: 0>} : vector<8x8xi32>
    %1 = tpu.iota {dimensions = array<i32: 1>} : vector<8x8xi32>
    %c0_i32 = arith.constant 0 : i32
    %2 = arith.cmpi eq, %arg1, %c0_i32 : i32
    %3 = arith.extui %2 : i1 to i32
    %c0_i32_0 = arith.constant 0 : i32
    %4 = arith.cmpi ne, %3, %c0_i32_0 : i32
    scf.if %4 {
      %c0_197 = arith.constant 0 : index
      %c0_198 = arith.constant 0 : index
      %c0_199 = arith.constant 0 : index
      %284 = vector.load %arg2[%c0_197, %c0_198, %c0_199] : memref<1x8x4xf32, #tpu.memory_space<vmem>>, vector<1x8x4xf32>
      %285 = vector.shape_cast %284 : vector<1x8x4xf32> to vector<8x4xf32>
      %c1_i32_200 = arith.constant 1 : i32
      %286 = vector.broadcast %c1_i32_200 : i32 to vector<8x8xi32>
      %287 = arith.subi %0, %286 : vector<8x8xi32>
      %288 = arith.cmpi eq, %1, %287 : vector<8x8xi32>
      %c0_i32_201 = arith.constant 0 : i32
      %289 = vector.broadcast %c0_i32_201 : i32 to vector<8x8xi32>
      %290 = arith.cmpi eq, %0, %289 : vector<8x8xi32>
      %c7_i32 = arith.constant 7 : i32
      %291 = vector.broadcast %c7_i32 : i32 to vector<8x8xi32>
      %292 = arith.cmpi eq, %1, %291 : vector<8x8xi32>
      %293 = arith.andi %290, %292 : vector<8x8xi1>
      %294 = arith.ori %288, %293 : vector<8x8xi1>
      %295 = arith.extui %294 : vector<8x8xi1> to vector<8x8xi32>
      %296 = arith.sitofp %295 : vector<8x8xi32> to vector<8x8xf32>
      %c1_i32_202 = arith.constant 1 : i32
      %297 = vector.broadcast %c1_i32_202 : i32 to vector<8x8xi32>
      %298 = arith.addi %0, %297 : vector<8x8xi32>
      %299 = arith.cmpi eq, %1, %298 : vector<8x8xi32>
      %c7_i32_203 = arith.constant 7 : i32
      %300 = vector.broadcast %c7_i32_203 : i32 to vector<8x8xi32>
      %301 = arith.cmpi eq, %0, %300 : vector<8x8xi32>
      %c0_i32_204 = arith.constant 0 : i32
      %302 = vector.broadcast %c0_i32_204 : i32 to vector<8x8xi32>
      %303 = arith.cmpi eq, %1, %302 : vector<8x8xi32>
      %304 = arith.andi %301, %303 : vector<8x8xi1>
      %305 = arith.ori %299, %304 : vector<8x8xi1>
      %306 = arith.extui %305 : vector<8x8xi1> to vector<8x8xi32>
      %307 = arith.sitofp %306 : vector<8x8xi32> to vector<8x8xf32>
      %cst_205 = arith.constant dense<0.000000e+00> : vector<8x4xf32>
      %308 = tpu.matmul %296, %285, %cst_205 {dimension_numbers = #tpu.dot_dimension_numbers<[1], [0], [0], [1], [0, 0, 1, 1], [], []>} : vector<8x8xf32>, vector<8x4xf32>, vector<8x4xf32> -> vector<8x4xf32>
      %cst_206 = arith.constant dense<0.000000e+00> : vector<8x4xf32>
      %309 = tpu.matmul %307, %285, %cst_206 {dimension_numbers = #tpu.dot_dimension_numbers<[1], [0], [0], [1], [0, 0, 1, 1], [], []>} : vector<8x8xf32>, vector<8x4xf32>, vector<8x4xf32> -> vector<8x4xf32>
      %c0_207 = arith.constant 0 : index
      %c0_208 = arith.constant 0 : index
      %c0_209 = arith.constant 0 : index
      %310 = vector.load %arg3[%c0_207, %c0_208, %c0_209] : memref<3x4x32xf32, #tpu.memory_space<vmem>>, vector<1x4x32xf32>
      %311 = vector.shape_cast %310 : vector<1x4x32xf32> to vector<4x32xf32>
      %cst_210 = arith.constant dense<0.000000e+00> : vector<8x32xf32>
      %312 = tpu.matmul %308, %311, %cst_210 {dimension_numbers = #tpu.dot_dimension_numbers<[1], [0], [0], [1], [0, 0, 1, 1], [], []>} : vector<8x4xf32>, vector<4x32xf32>, vector<8x32xf32> -> vector<8x32xf32>
      %c1_211 = arith.constant 1 : index
      %c0_212 = arith.constant 0 : index
      %c0_213 = arith.constant 0 : index
      %313 = vector.load %arg3[%c1_211, %c0_212, %c0_213] : memref<3x4x32xf32, #tpu.memory_space<vmem>>, vector<1x4x32xf32>
      %314 = vector.shape_cast %313 : vector<1x4x32xf32> to vector<4x32xf32>
      %cst_214 = arith.constant dense<0.000000e+00> : vector<8x32xf32>
      %315 = tpu.matmul %285, %314, %cst_214 {dimension_numbers = #tpu.dot_dimension_numbers<[1], [0], [0], [1], [0, 0, 1, 1], [], []>} : vector<8x4xf32>, vector<4x32xf32>, vector<8x32xf32> -> vector<8x32xf32>
      %316 = arith.addf %312, %315 : vector<8x32xf32>
      %c2_215 = arith.constant 2 : index
      %c0_216 = arith.constant 0 : index
      %c0_217 = arith.constant 0 : index
      %317 = vector.load %arg3[%c2_215, %c0_216, %c0_217] : memref<3x4x32xf32, #tpu.memory_space<vmem>>, vector<1x4x32xf32>
      %318 = vector.shape_cast %317 : vector<1x4x32xf32> to vector<4x32xf32>
      %cst_218 = arith.constant dense<0.000000e+00> : vector<8x32xf32>
      %319 = tpu.matmul %309, %318, %cst_218 {dimension_numbers = #tpu.dot_dimension_numbers<[1], [0], [0], [1], [0, 0, 1, 1], [], []>} : vector<8x4xf32>, vector<4x32xf32>, vector<8x32xf32> -> vector<8x32xf32>
      %320 = arith.addf %316, %319 : vector<8x32xf32>
      %c0_219 = arith.constant 0 : index
      %c0_220 = arith.constant 0 : index
      %321 = vector.load %arg4[%c0_219, %c0_220] : memref<8x32xf32, #tpu.memory_space<vmem>>, vector<8x32xf32>
      %322 = arith.addf %320, %321 : vector<8x32xf32>
      %c0_221 = arith.constant 0 : index
      %c0_222 = arith.constant 0 : index
      %323 = vector.load %arg26[%c0_221, %c0_222] : memref<8x32xf32, #tpu.memory_space<vmem>>, vector<8x32xf32>
      tpu.vector_store %arg26[%c0_221, %c0_222], %322 {strides = array<i32>} : memref<8x32xf32, #tpu.memory_space<vmem>>, vector<8x32xf32>,
    } else {
    }
    %c0 = arith.constant 0 : index
    %c0_1 = arith.constant 0 : index
    %5 = vector.load %arg26[%c0, %c0_1] : memref<8x32xf32, #tpu.memory_space<vmem>>, vector<8x32xf32>
    %6 = arith.truncf %5 : vector<8x32xf32> to vector<8x32xbf16>
    %7 = arith.cmpi sge, %0, %1 : vector<8x8xi32>
    %cst = arith.constant 0.000000e+00 : f32
    %8 = vector.broadcast %cst : f32 to vector<8x32xf32>
    %c0_2 = arith.constant 0 : index
    %c0_3 = arith.constant 0 : index
    %c0_4 = arith.constant 0 : index
    %c0_5 = arith.constant 0 : index
    %9 = vector.load %arg5[%c0_2, %c0_3, %c0_4, %c0_5] : memref<1x4x32x8xbf16, #tpu.memory_space<vmem>>, vector<1x1x32x8xbf16>
    %10 = vector.shape_cast %9 : vector<1x1x32x8xbf16> to vector<32x8xbf16>
    %cst_6 = arith.constant dense<0.000000e+00> : vector<8x8xf32>
    %11 = tpu.matmul %6, %10, %cst_6 {dimension_numbers = #tpu.dot_dimension_numbers<[1], [0], [0], [1], [0, 0, 1, 1], [], []>} : vector<8x32xbf16>, vector<32x8xbf16>, vector<8x8xf32> -> vector<8x8xf32>
    %c0_7 = arith.constant 0 : index
    %c0_8 = arith.constant 0 : index
    %c0_9 = arith.constant 0 : index
    %c0_10 = arith.constant 0 : index
    %12 = vector.load %arg6[%c0_7, %c0_8, %c0_9, %c0_10] : memref<1x4x1x8xf32, #tpu.memory_space<vmem>>, vector<1x1x1x8xf32>
    %13 = vector.shape_cast %12 : vector<1x1x1x8xf32> to vector<1x8xf32>
    %14 = vector.broadcast %13 : vector<1x8xf32> to vector<8x8xf32>
    %15 = arith.addf %11, %14 : vector<8x8xf32>
    %cst_11 = arith.constant 0.353553385 : f32
    %16 = vector.broadcast %cst_11 : f32 to vector<8x8xf32>
    %17 = arith.mulf %15, %16 : vector<8x8xf32>
    %c0_12 = arith.constant 0 : index
    %c0_13 = arith.constant 0 : index
    %c0_14 = arith.constant 0 : index
    %c0_15 = arith.constant 0 : index
    %18 = vector.load %arg7[%c0_12, %c0_13, %c0_14, %c0_15] : memref<1x4x32x8xbf16, #tpu.memory_space<vmem>>, vector<1x1x32x8xbf16>
    %19 = vector.shape_cast %18 : vector<1x1x32x8xbf16> to vector<32x8xbf16>
    %cst_16 = arith.constant dense<0.000000e+00> : vector<8x8xf32>
    %20 = tpu.matmul %6, %19, %cst_16 {dimension_numbers = #tpu.dot_dimension_numbers<[1], [0], [0], [1], [0, 0, 1, 1], [], []>} : vector<8x32xbf16>, vector<32x8xbf16>, vector<8x8xf32> -> vector<8x8xf32>
    %c0_17 = arith.constant 0 : index
    %c0_18 = arith.constant 0 : index
    %c0_19 = arith.constant 0 : index
    %c0_20 = arith.constant 0 : index
    %21 = vector.load %arg8[%c0_17, %c0_18, %c0_19, %c0_20] : memref<1x4x1x8xf32, #tpu.memory_space<vmem>>, vector<1x1x1x8xf32>
    %22 = vector.shape_cast %21 : vector<1x1x1x8xf32> to vector<1x8xf32>
    %23 = vector.broadcast %22 : vector<1x8xf32> to vector<8x8xf32>
    %24 = arith.addf %20, %23 : vector<8x8xf32>
    %c0_21 = arith.constant 0 : index
    %c0_22 = arith.constant 0 : index
    %c0_23 = arith.constant 0 : index
    %c0_24 = arith.constant 0 : index
    %25 = vector.load %arg9[%c0_21, %c0_22, %c0_23, %c0_24] : memref<1x4x32x8xbf16, #tpu.memory_space<vmem>>, vector<1x1x32x8xbf16>
    %26 = vector.shape_cast %25 : vector<1x1x32x8xbf16> to vector<32x8xbf16>
    %cst_25 = arith.constant dense<0.000000e+00> : vector<8x8xf32>
    %27 = tpu.matmul %6, %26, %cst_25 {dimension_numbers = #tpu.dot_dimension_numbers<[1], [0], [0], [1], [0, 0, 1, 1], [], []>} : vector<8x32xbf16>, vector<32x8xbf16>, vector<8x8xf32> -> vector<8x8xf32>
    %c0_26 = arith.constant 0 : index
    %c0_27 = arith.constant 0 : index
    %c0_28 = arith.constant 0 : index
    %c0_29 = arith.constant 0 : index
    %28 = vector.load %arg10[%c0_26, %c0_27, %c0_28, %c0_29] : memref<1x4x1x8xf32, #tpu.memory_space<vmem>>, vector<1x1x1x8xf32>
    %29 = vector.shape_cast %28 : vector<1x1x1x8xf32> to vector<1x8xf32>
    %30 = vector.broadcast %29 : vector<1x8xf32> to vector<8x8xf32>
    %31 = arith.addf %27, %30 : vector<8x8xf32>
    %32 = arith.truncf %17 : vector<8x8xf32> to vector<8x8xbf16>
    %33 = arith.truncf %24 : vector<8x8xf32> to vector<8x8xbf16>
    %cst_30 = arith.constant dense<0.000000e+00> : vector<8x8xf32>
    %34 = tpu.matmul %32, %33, %cst_30 {dimension_numbers = #tpu.dot_dimension_numbers<[1], [1], [0], [0], [0, 0, 1, 0], [], []>} : vector<8x8xbf16>, vector<8x8xbf16>, vector<8x8xf32> -> vector<8x8xf32>
    %cst_31 = arith.constant -1.000000e+30 : f32
    %35 = vector.broadcast %cst_31 : f32 to vector<8x8xf32>
    %36 = arith.select %7, %34, %35 : vector<8x8xi1>, vector<8x8xf32>
    %cst_32 = arith.constant dense<0xFF800000> : vector<8xf32>
    %37 = vector.multi_reduction <maximumf>, %36, %cst_32 [1] : vector<8x8xf32> to vector<8xf32>
    %38 = vector.shape_cast %37 : vector<8xf32> to vector<8x1xf32>
    %39 = vector.broadcast %38 : vector<8x1xf32> to vector<8x8xf32>
    %40 = arith.subf %36, %39 : vector<8x8xf32>
    %41 = math.exp %40 : vector<8x8xf32>
    %cst_33 = arith.constant dense<0.000000e+00> : vector<8xf32>
    %42 = vector.multi_reduction <add>, %41, %cst_33 [1] : vector<8x8xf32> to vector<8xf32>
    %43 = vector.shape_cast %42 : vector<8xf32> to vector<8x1xf32>
    %44 = tpu.reciprocal %43 {approx = true} : vector<8x1xf32> -> vector<8x1xf32>
    %45 = vector.broadcast %44 : vector<8x1xf32> to vector<8x8xf32>
    %46 = arith.mulf %41, %45 : vector<8x8xf32>
    %47 = arith.truncf %46 : vector<8x8xf32> to vector<8x8xbf16>
    %48 = arith.truncf %31 : vector<8x8xf32> to vector<8x8xbf16>
    %cst_34 = arith.constant dense<0.000000e+00> : vector<8x8xf32>
    %49 = tpu.matmul %47, %48, %cst_34 {dimension_numbers = #tpu.dot_dimension_numbers<[1], [0], [0], [1], [0, 0, 1, 1], [], []>} : vector<8x8xbf16>, vector<8x8xbf16>, vector<8x8xf32> -> vector<8x8xf32>
    %50 = arith.truncf %49 : vector<8x8xf32> to vector<8x8xbf16>
    %c0_35 = arith.constant 0 : index
    %c0_36 = arith.constant 0 : index
    %c0_37 = arith.constant 0 : index
    %c0_38 = arith.constant 0 : index
    %51 = vector.load %arg11[%c0_35, %c0_36, %c0_37, %c0_38] : memref<1x4x8x32xbf16, #tpu.memory_space<vmem>>, vector<1x1x8x32xbf16>
    %52 = vector.shape_cast %51 : vector<1x1x8x32xbf16> to vector<8x32xbf16>
    %cst_39 = arith.constant dense<0.000000e+00> : vector<8x32xf32>
    %53 = tpu.matmul %50, %52, %cst_39 {dimension_numbers = #tpu.dot_dimension_numbers<[1], [0], [0], [1], [0, 0, 1, 1], [], []>} : vector<8x8xbf16>, vector<8x32xbf16>, vector<8x32xf32> -> vector<8x32xf32>
    %54 = arith.addf %8, %53 : vector<8x32xf32>
    %c0_40 = arith.constant 0 : index
    %c1 = arith.constant 1 : index
    %c0_41 = arith.constant 0 : index
    %c0_42 = arith.constant 0 : index
    %55 = vector.load %arg5[%c0_40, %c1, %c0_41, %c0_42] : memref<1x4x32x8xbf16, #tpu.memory_space<vmem>>, vector<1x1x32x8xbf16>
    %56 = vector.shape_cast %55 : vector<1x1x32x8xbf16> to vector<32x8xbf16>
    %cst_43 = arith.constant dense<0.000000e+00> : vector<8x8xf32>
    %57 = tpu.matmul %6, %56, %cst_43 {dimension_numbers = #tpu.dot_dimension_numbers<[1], [0], [0], [1], [0, 0, 1, 1], [], []>} : vector<8x32xbf16>, vector<32x8xbf16>, vector<8x8xf32> -> vector<8x8xf32>
    %c0_44 = arith.constant 0 : index
    %c1_45 = arith.constant 1 : index
    %c0_46 = arith.constant 0 : index
    %c0_47 = arith.constant 0 : index
    %58 = vector.load %arg6[%c0_44, %c1_45, %c0_46, %c0_47] : memref<1x4x1x8xf32, #tpu.memory_space<vmem>>, vector<1x1x1x8xf32>
    %59 = vector.shape_cast %58 : vector<1x1x1x8xf32> to vector<1x8xf32>
    %60 = vector.broadcast %59 : vector<1x8xf32> to vector<8x8xf32>
    %61 = arith.addf %57, %60 : vector<8x8xf32>
    %cst_48 = arith.constant 0.353553385 : f32
    %62 = vector.broadcast %cst_48 : f32 to vector<8x8xf32>
    %63 = arith.mulf %61, %62 : vector<8x8xf32>
    %c0_49 = arith.constant 0 : index
    %c1_50 = arith.constant 1 : index
    %c0_51 = arith.constant 0 : index
    %c0_52 = arith.constant 0 : index
    %64 = vector.load %arg7[%c0_49, %c1_50, %c0_51, %c0_52] : memref<1x4x32x8xbf16, #tpu.memory_space<vmem>>, vector<1x1x32x8xbf16>
    %65 = vector.shape_cast %64 : vector<1x1x32x8xbf16> to vector<32x8xbf16>
    %cst_53 = arith.constant dense<0.000000e+00> : vector<8x8xf32>
    %66 = tpu.matmul %6, %65, %cst_53 {dimension_numbers = #tpu.dot_dimension_numbers<[1], [0], [0], [1], [0, 0, 1, 1], [], []>} : vector<8x32xbf16>, vector<32x8xbf16>, vector<8x8xf32> -> vector<8x8xf32>
    %c0_54 = arith.constant 0 : index
    %c1_55 = arith.constant 1 : index
    %c0_56 = arith.constant 0 : index
    %c0_57 = arith.constant 0 : index
    %67 = vector.load %arg8[%c0_54, %c1_55, %c0_56, %c0_57] : memref<1x4x1x8xf32, #tpu.memory_space<vmem>>, vector<1x1x1x8xf32>
    %68 = vector.shape_cast %67 : vector<1x1x1x8xf32> to vector<1x8xf32>
    %69 = vector.broadcast %68 : vector<1x8xf32> to vector<8x8xf32>
    %70 = arith.addf %66, %69 : vector<8x8xf32>
    %c0_58 = arith.constant 0 : index
    %c1_59 = arith.constant 1 : index
    %c0_60 = arith.constant 0 : index
    %c0_61 = arith.constant 0 : index
    %71 = vector.load %arg9[%c0_58, %c1_59, %c0_60, %c0_61] : memref<1x4x32x8xbf16, #tpu.memory_space<vmem>>, vector<1x1x32x8xbf16>
    %72 = vector.shape_cast %71 : vector<1x1x32x8xbf16> to vector<32x8xbf16>
    %cst_62 = arith.constant dense<0.000000e+00> : vector<8x8xf32>
    %73 = tpu.matmul %6, %72, %cst_62 {dimension_numbers = #tpu.dot_dimension_numbers<[1], [0], [0], [1], [0, 0, 1, 1], [], []>} : vector<8x32xbf16>, vector<32x8xbf16>, vector<8x8xf32> -> vector<8x8xf32>
    %c0_63 = arith.constant 0 : index
    %c1_64 = arith.constant 1 : index
    %c0_65 = arith.constant 0 : index
    %c0_66 = arith.constant 0 : index
    %74 = vector.load %arg10[%c0_63, %c1_64, %c0_65, %c0_66] : memref<1x4x1x8xf32, #tpu.memory_space<vmem>>, vector<1x1x1x8xf32>
    %75 = vector.shape_cast %74 : vector<1x1x1x8xf32> to vector<1x8xf32>
    %76 = vector.broadcast %75 : vector<1x8xf32> to vector<8x8xf32>
    %77 = arith.addf %73, %76 : vector<8x8xf32>
    %78 = arith.truncf %63 : vector<8x8xf32> to vector<8x8xbf16>
    %79 = arith.truncf %70 : vector<8x8xf32> to vector<8x8xbf16>
    %cst_67 = arith.constant dense<0.000000e+00> : vector<8x8xf32>
    %80 = tpu.matmul %78, %79, %cst_67 {dimension_numbers = #tpu.dot_dimension_numbers<[1], [1], [0], [0], [0, 0, 1, 0], [], []>} : vector<8x8xbf16>, vector<8x8xbf16>, vector<8x8xf32> -> vector<8x8xf32>
    %cst_68 = arith.constant -1.000000e+30 : f32
    %81 = vector.broadcast %cst_68 : f32 to vector<8x8xf32>
    %82 = arith.select %7, %80, %81 : vector<8x8xi1>, vector<8x8xf32>
    %cst_69 = arith.constant dense<0xFF800000> : vector<8xf32>
    %83 = vector.multi_reduction <maximumf>, %82, %cst_69 [1] : vector<8x8xf32> to vector<8xf32>
    %84 = vector.shape_cast %83 : vector<8xf32> to vector<8x1xf32>
    %85 = vector.broadcast %84 : vector<8x1xf32> to vector<8x8xf32>
    %86 = arith.subf %82, %85 : vector<8x8xf32>
    %87 = math.exp %86 : vector<8x8xf32>
    %cst_70 = arith.constant dense<0.000000e+00> : vector<8xf32>
    %88 = vector.multi_reduction <add>, %87, %cst_70 [1] : vector<8x8xf32> to vector<8xf32>
    %89 = vector.shape_cast %88 : vector<8xf32> to vector<8x1xf32>
    %90 = tpu.reciprocal %89 {approx = true} : vector<8x1xf32> -> vector<8x1xf32>
    %91 = vector.broadcast %90 : vector<8x1xf32> to vector<8x8xf32>
    %92 = arith.mulf %87, %91 : vector<8x8xf32>
    %93 = arith.truncf %92 : vector<8x8xf32> to vector<8x8xbf16>
    %94 = arith.truncf %77 : vector<8x8xf32> to vector<8x8xbf16>
    %cst_71 = arith.constant dense<0.000000e+00> : vector<8x8xf32>
    %95 = tpu.matmul %93, %94, %cst_71 {dimension_numbers = #tpu.dot_dimension_numbers<[1], [0], [0], [1], [0, 0, 1, 1], [], []>} : vector<8x8xbf16>, vector<8x8xbf16>, vector<8x8xf32> -> vector<8x8xf32>
    %96 = arith.truncf %95 : vector<8x8xf32> to vector<8x8xbf16>
    %c0_72 = arith.constant 0 : index
    %c1_73 = arith.constant 1 : index
    %c0_74 = arith.constant 0 : index
    %c0_75 = arith.constant 0 : index
    %97 = vector.load %arg11[%c0_72, %c1_73, %c0_74, %c0_75] : memref<1x4x8x32xbf16, #tpu.memory_space<vmem>>, vector<1x1x8x32xbf16>
    %98 = vector.shape_cast %97 : vector<1x1x8x32xbf16> to vector<8x32xbf16>
    %cst_76 = arith.constant dense<0.000000e+00> : vector<8x32xf32>
    %99 = tpu.matmul %96, %98, %cst_76 {dimension_numbers = #tpu.dot_dimension_numbers<[1], [0], [0], [1], [0, 0, 1, 1], [], []>} : vector<8x8xbf16>, vector<8x32xbf16>, vector<8x32xf32> -> vector<8x32xf32>
    %100 = arith.addf %54, %99 : vector<8x32xf32>
    %c0_77 = arith.constant 0 : index
    %c2 = arith.constant 2 : index
    %c0_78 = arith.constant 0 : index
    %c0_79 = arith.constant 0 : index
    %101 = vector.load %arg5[%c0_77, %c2, %c0_78, %c0_79] : memref<1x4x32x8xbf16, #tpu.memory_space<vmem>>, vector<1x1x32x8xbf16>
    %102 = vector.shape_cast %101 : vector<1x1x32x8xbf16> to vector<32x8xbf16>
    %cst_80 = arith.constant dense<0.000000e+00> : vector<8x8xf32>
    %103 = tpu.matmul %6, %102, %cst_80 {dimension_numbers = #tpu.dot_dimension_numbers<[1], [0], [0], [1], [0, 0, 1, 1], [], []>} : vector<8x32xbf16>, vector<32x8xbf16>, vector<8x8xf32> -> vector<8x8xf32>
    %c0_81 = arith.constant 0 : index
    %c2_82 = arith.constant 2 : index
    %c0_83 = arith.constant 0 : index
    %c0_84 = arith.constant 0 : index
    %104 = vector.load %arg6[%c0_81, %c2_82, %c0_83, %c0_84] : memref<1x4x1x8xf32, #tpu.memory_space<vmem>>, vector<1x1x1x8xf32>
    %105 = vector.shape_cast %104 : vector<1x1x1x8xf32> to vector<1x8xf32>
    %106 = vector.broadcast %105 : vector<1x8xf32> to vector<8x8xf32>
    %107 = arith.addf %103, %106 : vector<8x8xf32>
    %cst_85 = arith.constant 0.353553385 : f32
    %108 = vector.broadcast %cst_85 : f32 to vector<8x8xf32>
    %109 = arith.mulf %107, %108 : vector<8x8xf32>
    %c0_86 = arith.constant 0 : index
    %c2_87 = arith.constant 2 : index
    %c0_88 = arith.constant 0 : index
    %c0_89 = arith.constant 0 : index
    %110 = vector.load %arg7[%c0_86, %c2_87, %c0_88, %c0_89] : memref<1x4x32x8xbf16, #tpu.memory_space<vmem>>, vector<1x1x32x8xbf16>
    %111 = vector.shape_cast %110 : vector<1x1x32x8xbf16> to vector<32x8xbf16>
    %cst_90 = arith.constant dense<0.000000e+00> : vector<8x8xf32>
    %112 = tpu.matmul %6, %111, %cst_90 {dimension_numbers = #tpu.dot_dimension_numbers<[1], [0], [0], [1], [0, 0, 1, 1], [], []>} : vector<8x32xbf16>, vector<32x8xbf16>, vector<8x8xf32> -> vector<8x8xf32>
    %c0_91 = arith.constant 0 : index
    %c2_92 = arith.constant 2 : index
    %c0_93 = arith.constant 0 : index
    %c0_94 = arith.constant 0 : index
    %113 = vector.load %arg8[%c0_91, %c2_92, %c0_93, %c0_94] : memref<1x4x1x8xf32, #tpu.memory_space<vmem>>, vector<1x1x1x8xf32>
    %114 = vector.shape_cast %113 : vector<1x1x1x8xf32> to vector<1x8xf32>
    %115 = vector.broadcast %114 : vector<1x8xf32> to vector<8x8xf32>
    %116 = arith.addf %112, %115 : vector<8x8xf32>
    %c0_95 = arith.constant 0 : index
    %c2_96 = arith.constant 2 : index
    %c0_97 = arith.constant 0 : index
    %c0_98 = arith.constant 0 : index
    %117 = vector.load %arg9[%c0_95, %c2_96, %c0_97, %c0_98] : memref<1x4x32x8xbf16, #tpu.memory_space<vmem>>, vector<1x1x32x8xbf16>
    %118 = vector.shape_cast %117 : vector<1x1x32x8xbf16> to vector<32x8xbf16>
    %cst_99 = arith.constant dense<0.000000e+00> : vector<8x8xf32>
    %119 = tpu.matmul %6, %118, %cst_99 {dimension_numbers = #tpu.dot_dimension_numbers<[1], [0], [0], [1], [0, 0, 1, 1], [], []>} : vector<8x32xbf16>, vector<32x8xbf16>, vector<8x8xf32> -> vector<8x8xf32>
    %c0_100 = arith.constant 0 : index
    %c2_101 = arith.constant 2 : index
    %c0_102 = arith.constant 0 : index
    %c0_103 = arith.constant 0 : index
    %120 = vector.load %arg10[%c0_100, %c2_101, %c0_102, %c0_103] : memref<1x4x1x8xf32, #tpu.memory_space<vmem>>, vector<1x1x1x8xf32>
    %121 = vector.shape_cast %120 : vector<1x1x1x8xf32> to vector<1x8xf32>
    %122 = vector.broadcast %121 : vector<1x8xf32> to vector<8x8xf32>
    %123 = arith.addf %119, %122 : vector<8x8xf32>
    %124 = arith.truncf %109 : vector<8x8xf32> to vector<8x8xbf16>
    %125 = arith.truncf %116 : vector<8x8xf32> to vector<8x8xbf16>
    %cst_104 = arith.constant dense<0.000000e+00> : vector<8x8xf32>
    %126 = tpu.matmul %124, %125, %cst_104 {dimension_numbers = #tpu.dot_dimension_numbers<[1], [1], [0], [0], [0, 0, 1, 0], [], []>} : vector<8x8xbf16>, vector<8x8xbf16>, vector<8x8xf32> -> vector<8x8xf32>
    %cst_105 = arith.constant -1.000000e+30 : f32
    %127 = vector.broadcast %cst_105 : f32 to vector<8x8xf32>
    %128 = arith.select %7, %126, %127 : vector<8x8xi1>, vector<8x8xf32>
    %cst_106 = arith.constant dense<0xFF800000> : vector<8xf32>
    %129 = vector.multi_reduction <maximumf>, %128, %cst_106 [1] : vector<8x8xf32> to vector<8xf32>
    %130 = vector.shape_cast %129 : vector<8xf32> to vector<8x1xf32>
    %131 = vector.broadcast %130 : vector<8x1xf32> to vector<8x8xf32>
    %132 = arith.subf %128, %131 : vector<8x8xf32>
    %133 = math.exp %132 : vector<8x8xf32>
    %cst_107 = arith.constant dense<0.000000e+00> : vector<8xf32>
    %134 = vector.multi_reduction <add>, %133, %cst_107 [1] : vector<8x8xf32> to vector<8xf32>
    %135 = vector.shape_cast %134 : vector<8xf32> to vector<8x1xf32>
    %136 = tpu.reciprocal %135 {approx = true} : vector<8x1xf32> -> vector<8x1xf32>
    %137 = vector.broadcast %136 : vector<8x1xf32> to vector<8x8xf32>
    %138 = arith.mulf %133, %137 : vector<8x8xf32>
    %139 = arith.truncf %138 : vector<8x8xf32> to vector<8x8xbf16>
    %140 = arith.truncf %123 : vector<8x8xf32> to vector<8x8xbf16>
    %cst_108 = arith.constant dense<0.000000e+00> : vector<8x8xf32>
    %141 = tpu.matmul %139, %140, %cst_108 {dimension_numbers = #tpu.dot_dimension_numbers<[1], [0], [0], [1], [0, 0, 1, 1], [], []>} : vector<8x8xbf16>, vector<8x8xbf16>, vector<8x8xf32> -> vector<8x8xf32>
    %142 = arith.truncf %141 : vector<8x8xf32> to vector<8x8xbf16>
    %c0_109 = arith.constant 0 : index
    %c2_110 = arith.constant 2 : index
    %c0_111 = arith.constant 0 : index
    %c0_112 = arith.constant 0 : index
    %143 = vector.load %arg11[%c0_109, %c2_110, %c0_111, %c0_112] : memref<1x4x8x32xbf16, #tpu.memory_space<vmem>>, vector<1x1x8x32xbf16>
    %144 = vector.shape_cast %143 : vector<1x1x8x32xbf16> to vector<8x32xbf16>
    %cst_113 = arith.constant dense<0.000000e+00> : vector<8x32xf32>
    %145 = tpu.matmul %142, %144, %cst_113 {dimension_numbers = #tpu.dot_dimension_numbers<[1], [0], [0], [1], [0, 0, 1, 1], [], []>} : vector<8x8xbf16>, vector<8x32xbf16>, vector<8x32xf32> -> vector<8x32xf32>
    %146 = arith.addf %100, %145 : vector<8x32xf32>
    %c0_114 = arith.constant 0 : index
    %c3 = arith.constant 3 : index
    %c0_115 = arith.constant 0 : index
    %c0_116 = arith.constant 0 : index
    %147 = vector.load %arg5[%c0_114, %c3, %c0_115, %c0_116] : memref<1x4x32x8xbf16, #tpu.memory_space<vmem>>, vector<1x1x32x8xbf16>
    %148 = vector.shape_cast %147 : vector<1x1x32x8xbf16> to vector<32x8xbf16>
    %cst_117 = arith.constant dense<0.000000e+00> : vector<8x8xf32>
    %149 = tpu.matmul %6, %148, %cst_117 {dimension_numbers = #tpu.dot_dimension_numbers<[1], [0], [0], [1], [0, 0, 1, 1], [], []>} : vector<8x32xbf16>, vector<32x8xbf16>, vector<8x8xf32> -> vector<8x8xf32>
    %c0_118 = arith.constant 0 : index
    %c3_119 = arith.constant 3 : index
    %c0_120 = arith.constant 0 : index
    %c0_121 = arith.constant 0 : index
    %150 = vector.load %arg6[%c0_118, %c3_119, %c0_120, %c0_121] : memref<1x4x1x8xf32, #tpu.memory_space<vmem>>, vector<1x1x1x8xf32>
    %151 = vector.shape_cast %150 : vector<1x1x1x8xf32> to vector<1x8xf32>
    %152 = vector.broadcast %151 : vector<1x8xf32> to vector<8x8xf32>
    %153 = arith.addf %149, %152 : vector<8x8xf32>
    %cst_122 = arith.constant 0.353553385 : f32
    %154 = vector.broadcast %cst_122 : f32 to vector<8x8xf32>
    %155 = arith.mulf %153, %154 : vector<8x8xf32>
    %c0_123 = arith.constant 0 : index
    %c3_124 = arith.constant 3 : index
    %c0_125 = arith.constant 0 : index
    %c0_126 = arith.constant 0 : index
    %156 = vector.load %arg7[%c0_123, %c3_124, %c0_125, %c0_126] : memref<1x4x32x8xbf16, #tpu.memory_space<vmem>>, vector<1x1x32x8xbf16>
    %157 = vector.shape_cast %156 : vector<1x1x32x8xbf16> to vector<32x8xbf16>
    %cst_127 = arith.constant dense<0.000000e+00> : vector<8x8xf32>
    %158 = tpu.matmul %6, %157, %cst_127 {dimension_numbers = #tpu.dot_dimension_numbers<[1], [0], [0], [1], [0, 0, 1, 1], [], []>} : vector<8x32xbf16>, vector<32x8xbf16>, vector<8x8xf32> -> vector<8x8xf32>
    %c0_128 = arith.constant 0 : index
    %c3_129 = arith.constant 3 : index
    %c0_130 = arith.constant 0 : index
    %c0_131 = arith.constant 0 : index
    %159 = vector.load %arg8[%c0_128, %c3_129, %c0_130, %c0_131] : memref<1x4x1x8xf32, #tpu.memory_space<vmem>>, vector<1x1x1x8xf32>
    %160 = vector.shape_cast %159 : vector<1x1x1x8xf32> to vector<1x8xf32>
    %161 = vector.broadcast %160 : vector<1x8xf32> to vector<8x8xf32>
    %162 = arith.addf %158, %161 : vector<8x8xf32>
    %c0_132 = arith.constant 0 : index
    %c3_133 = arith.constant 3 : index
    %c0_134 = arith.constant 0 : index
    %c0_135 = arith.constant 0 : index
    %163 = vector.load %arg9[%c0_132, %c3_133, %c0_134, %c0_135] : memref<1x4x32x8xbf16, #tpu.memory_space<vmem>>, vector<1x1x32x8xbf16>
    %164 = vector.shape_cast %163 : vector<1x1x32x8xbf16> to vector<32x8xbf16>
    %cst_136 = arith.constant dense<0.000000e+00> : vector<8x8xf32>
    %165 = tpu.matmul %6, %164, %cst_136 {dimension_numbers = #tpu.dot_dimension_numbers<[1], [0], [0], [1], [0, 0, 1, 1], [], []>} : vector<8x32xbf16>, vector<32x8xbf16>, vector<8x8xf32> -> vector<8x8xf32>
    %c0_137 = arith.constant 0 : index
    %c3_138 = arith.constant 3 : index
    %c0_139 = arith.constant 0 : index
    %c0_140 = arith.constant 0 : index
    %166 = vector.load %arg10[%c0_137, %c3_138, %c0_139, %c0_140] : memref<1x4x1x8xf32, #tpu.memory_space<vmem>>, vector<1x1x1x8xf32>
    %167 = vector.shape_cast %166 : vector<1x1x1x8xf32> to vector<1x8xf32>
    %168 = vector.broadcast %167 : vector<1x8xf32> to vector<8x8xf32>
    %169 = arith.addf %165, %168 : vector<8x8xf32>
    %170 = arith.truncf %155 : vector<8x8xf32> to vector<8x8xbf16>
    %171 = arith.truncf %162 : vector<8x8xf32> to vector<8x8xbf16>
    %cst_141 = arith.constant dense<0.000000e+00> : vector<8x8xf32>
    %172 = tpu.matmul %170, %171, %cst_141 {dimension_numbers = #tpu.dot_dimension_numbers<[1], [1], [0], [0], [0, 0, 1, 0], [], []>} : vector<8x8xbf16>, vector<8x8xbf16>, vector<8x8xf32> -> vector<8x8xf32>
    %cst_142 = arith.constant -1.000000e+30 : f32
    %173 = vector.broadcast %cst_142 : f32 to vector<8x8xf32>
    %174 = arith.select %7, %172, %173 : vector<8x8xi1>, vector<8x8xf32>
    %cst_143 = arith.constant dense<0xFF800000> : vector<8xf32>
    %175 = vector.multi_reduction <maximumf>, %174, %cst_143 [1] : vector<8x8xf32> to vector<8xf32>
    %176 = vector.shape_cast %175 : vector<8xf32> to vector<8x1xf32>
    %177 = vector.broadcast %176 : vector<8x1xf32> to vector<8x8xf32>
    %178 = arith.subf %174, %177 : vector<8x8xf32>
    %179 = math.exp %178 : vector<8x8xf32>
    %cst_144 = arith.constant dense<0.000000e+00> : vector<8xf32>
    %180 = vector.multi_reduction <add>, %179, %cst_144 [1] : vector<8x8xf32> to vector<8xf32>
    %181 = vector.shape_cast %180 : vector<8xf32> to vector<8x1xf32>
    %182 = tpu.reciprocal %181 {approx = true} : vector<8x1xf32> -> vector<8x1xf32>
    %183 = vector.broadcast %182 : vector<8x1xf32> to vector<8x8xf32>
    %184 = arith.mulf %179, %183 : vector<8x8xf32>
    %185 = arith.truncf %184 : vector<8x8xf32> to vector<8x8xbf16>
    %186 = arith.truncf %169 : vector<8x8xf32> to vector<8x8xbf16>
    %cst_145 = arith.constant dense<0.000000e+00> : vector<8x8xf32>
    %187 = tpu.matmul %185, %186, %cst_145 {dimension_numbers = #tpu.dot_dimension_numbers<[1], [0], [0], [1], [0, 0, 1, 1], [], []>} : vector<8x8xbf16>, vector<8x8xbf16>, vector<8x8xf32> -> vector<8x8xf32>
    %188 = arith.truncf %187 : vector<8x8xf32> to vector<8x8xbf16>
    %c0_146 = arith.constant 0 : index
    %c3_147 = arith.constant 3 : index
    %c0_148 = arith.constant 0 : index
    %c0_149 = arith.constant 0 : index
    %189 = vector.load %arg11[%c0_146, %c3_147, %c0_148, %c0_149] : memref<1x4x8x32xbf16, #tpu.memory_space<vmem>>, vector<1x1x8x32xbf16>
    %190 = vector.shape_cast %189 : vector<1x1x8x32xbf16> to vector<8x32xbf16>
    %cst_150 = arith.constant dense<0.000000e+00> : vector<8x32xf32>
    %191 = tpu.matmul %188, %190, %cst_150 {dimension_numbers = #tpu.dot_dimension_numbers<[1], [0], [0], [1], [0, 0, 1, 1], [], []>} : vector<8x8xbf16>, vector<8x32xbf16>, vector<8x32xf32> -> vector<8x32xf32>
    %192 = arith.addf %146, %191 : vector<8x32xf32>
    %c0_151 = arith.constant 0 : index
    %c0_152 = arith.constant 0 : index
    %c0_153 = arith.constant 0 : index
    %193 = vector.load %arg12[%c0_151, %c0_152, %c0_153] : memref<1x1x32xf32, #tpu.memory_space<vmem>>, vector<1x1x32xf32>
    %194 = vector.shape_cast %193 : vector<1x1x32xf32> to vector<1x32xf32>
    %195 = vector.broadcast %194 : vector<1x32xf32> to vector<8x32xf32>
    %196 = arith.addf %192, %195 : vector<8x32xf32>
    %197 = arith.addf %5, %196 : vector<8x32xf32>
    %c0_154 = arith.constant 0 : index
    %c0_155 = arith.constant 0 : index
    %c0_156 = arith.constant 0 : index
    %198 = vector.load %arg17[%c0_154, %c0_155, %c0_156] : memref<1x1x32xf32, #tpu.memory_space<vmem>>, vector<1x1x32xf32>
    %199 = vector.shape_cast %198 : vector<1x1x32xf32> to vector<1x32xf32>
    %c0_157 = arith.constant 0 : index
    %c0_158 = arith.constant 0 : index
    %c0_159 = arith.constant 0 : index
    %200 = vector.load %arg18[%c0_157, %c0_158, %c0_159] : memref<1x1x32xf32, #tpu.memory_space<vmem>>, vector<1x1x32xf32>
    %201 = vector.shape_cast %200 : vector<1x1x32xf32> to vector<1x32xf32>
    %cst_160 = arith.constant dense<0.000000e+00> : vector<8xf32>
    %202 = vector.multi_reduction <add>, %197, %cst_160 [1] : vector<8x32xf32> to vector<8xf32>
    %203 = vector.shape_cast %202 : vector<8xf32> to vector<8x1xf32>
    %cst_161 = arith.constant 3.200000e+01 : f32
    %204 = vector.broadcast %cst_161 : f32 to vector<8x1xf32>
    %205 = arith.divf %203, %204 : vector<8x1xf32>
    %206 = vector.broadcast %205 : vector<8x1xf32> to vector<8x32xf32>
    %207 = arith.subf %197, %206 : vector<8x32xf32>
    %208 = arith.mulf %207, %207 : vector<8x32xf32>
    %cst_162 = arith.constant dense<0.000000e+00> : vector<8xf32>
    %209 = vector.multi_reduction <add>, %208, %cst_162 [1] : vector<8x32xf32> to vector<8xf32>
    %210 = vector.shape_cast %209 : vector<8xf32> to vector<8x1xf32>
    %cst_163 = arith.constant 3.200000e+01 : f32
    %211 = vector.broadcast %cst_163 : f32 to vector<8x1xf32>
    %212 = arith.divf %210, %211 : vector<8x1xf32>
    %213 = vector.broadcast %205 : vector<8x1xf32> to vector<8x32xf32>
    %214 = arith.subf %197, %213 : vector<8x32xf32>
    %cst_164 = arith.constant 9.99999974E-6 : f32
    %215 = vector.broadcast %cst_164 : f32 to vector<8x1xf32>
    %216 = arith.addf %212, %215 : vector<8x1xf32>
    %217 = math.rsqrt %216 : vector<8x1xf32>
    %218 = vector.broadcast %217 : vector<8x1xf32> to vector<8x32xf32>
    %219 = arith.mulf %214, %218 : vector<8x32xf32>
    %220 = vector.broadcast %199 : vector<1x32xf32> to vector<8x32xf32>
    %221 = arith.mulf %219, %220 : vector<8x32xf32>
    %222 = vector.broadcast %201 : vector<1x32xf32> to vector<8x32xf32>
    %223 = arith.addf %221, %222 : vector<8x32xf32>
    %224 = arith.truncf %223 : vector<8x32xf32> to vector<8x32xbf16>
    %c0_165 = arith.constant 0 : index
    %c0_166 = arith.constant 0 : index
    %c0_167 = arith.constant 0 : index
    %225 = vector.load %arg13[%c0_165, %c0_166, %c0_167] : memref<1x32x64xbf16, #tpu.memory_space<vmem>>, vector<1x32x64xbf16>
    %226 = vector.shape_cast %225 : vector<1x32x64xbf16> to vector<32x64xbf16>
    %cst_168 = arith.constant dense<0.000000e+00> : vector<8x64xf32>
    %227 = tpu.matmul %224, %226, %cst_168 {dimension_numbers = #tpu.dot_dimension_numbers<[1], [0], [0], [1], [0, 0, 1, 1], [], []>} : vector<8x32xbf16>, vector<32x64xbf16>, vector<8x64xf32> -> vector<8x64xf32>
    %c0_169 = arith.constant 0 : index
    %c0_170 = arith.constant 0 : index
    %c0_171 = arith.constant 0 : index
    %228 = vector.load %arg14[%c0_169, %c0_170, %c0_171] : memref<1x1x64xf32, #tpu.memory_space<vmem>>, vector<1x1x64xf32>
    %229 = vector.shape_cast %228 : vector<1x1x64xf32> to vector<1x64xf32>
    %230 = vector.broadcast %229 : vector<1x64xf32> to vector<8x64xf32>
    %231 = arith.addf %227, %230 : vector<8x64xf32>
    %cst_172 = arith.constant 5.000000e-01 : f32
    %232 = vector.broadcast %cst_172 : f32 to vector<8x64xf32>
    %233 = arith.mulf %232, %231 : vector<8x64xf32>
    %cst_173 = arith.constant 4.471500e-02 : f32
    %234 = vector.broadcast %cst_173 : f32 to vector<8x64xf32>
    %235 = arith.mulf %234, %231 : vector<8x64xf32>
    %236 = arith.mulf %235, %231 : vector<8x64xf32>
    %237 = arith.mulf %236, %231 : vector<8x64xf32>
    %238 = arith.addf %231, %237 : vector<8x64xf32>
    %cst_174 = arith.constant 0.797884583 : f32
    %239 = vector.broadcast %cst_174 : f32 to vector<8x64xf32>
    %240 = arith.mulf %239, %238 : vector<8x64xf32>
    %241 = math.tanh %240 : vector<8x64xf32>
    %cst_175 = arith.constant 1.000000e+00 : f32
    %242 = vector.broadcast %cst_175 : f32 to vector<8x64xf32>
    %243 = arith.addf %242, %241 : vector<8x64xf32>
    %244 = arith.mulf %233, %243 : vector<8x64xf32>
    %245 = arith.truncf %244 : vector<8x64xf32> to vector<8x64xbf16>
    %c0_176 = arith.constant 0 : index
    %c0_177 = arith.constant 0 : index
    %c0_178 = arith.constant 0 : index
    %246 = vector.load %arg15[%c0_176, %c0_177, %c0_178] : memref<1x64x32xbf16, #tpu.memory_space<vmem>>, vector<1x64x32xbf16>
    %247 = vector.shape_cast %246 : vector<1x64x32xbf16> to vector<64x32xbf16>
    %cst_179 = arith.constant dense<0.000000e+00> : vector<8x32xf32>
    %248 = tpu.matmul %245, %247, %cst_179 {dimension_numbers = #tpu.dot_dimension_numbers<[1], [0], [0], [1], [0, 0, 1, 1], [], []>} : vector<8x64xbf16>, vector<64x32xbf16>, vector<8x32xf32> -> vector<8x32xf32>
    %c0_180 = arith.constant 0 : index
    %c0_181 = arith.constant 0 : index
    %c0_182 = arith.constant 0 : index
    %249 = vector.load %arg16[%c0_180, %c0_181, %c0_182] : memref<1x1x32xf32, #tpu.memory_space<vmem>>, vector<1x1x32xf32>
    %250 = vector.shape_cast %249 : vector<1x1x32xf32> to vector<1x32xf32>
    %251 = vector.broadcast %250 : vector<1x32xf32> to vector<8x32xf32>
    %252 = arith.addf %248, %251 : vector<8x32xf32>
    %253 = arith.addf %223, %252 : vector<8x32xf32>
    %c0_183 = arith.constant 0 : index
    %c0_184 = arith.constant 0 : index
    %c0_185 = arith.constant 0 : index
    %254 = vector.load %arg19[%c0_183, %c0_184, %c0_185] : memref<1x1x32xf32, #tpu.memory_space<vmem>>, vector<1x1x32xf32>
    %255 = vector.shape_cast %254 : vector<1x1x32xf32> to vector<1x32xf32>
    %c0_186 = arith.constant 0 : index
    %c0_187 = arith.constant 0 : index
    %c0_188 = arith.constant 0 : index
    %256 = vector.load %arg20[%c0_186, %c0_187, %c0_188] : memref<1x1x32xf32, #tpu.memory_space<vmem>>, vector<1x1x32xf32>
    %257 = vector.shape_cast %256 : vector<1x1x32xf32> to vector<1x32xf32>
    %cst_189 = arith.constant dense<0.000000e+00> : vector<8xf32>
    %258 = vector.multi_reduction <add>, %253, %cst_189 [1] : vector<8x32xf32> to vector<8xf32>
    %259 = vector.shape_cast %258 : vector<8xf32> to vector<8x1xf32>
    %cst_190 = arith.constant 3.200000e+01 : f32
    %260 = vector.broadcast %cst_190 : f32 to vector<8x1xf32>
    %261 = arith.divf %259, %260 : vector<8x1xf32>
    %262 = vector.broadcast %261 : vector<8x1xf32> to vector<8x32xf32>
    %263 = arith.subf %253, %262 : vector<8x32xf32>
    %264 = arith.mulf %263, %263 : vector<8x32xf32>
    %cst_191 = arith.constant dense<0.000000e+00> : vector<8xf32>
    %265 = vector.multi_reduction <add>, %264, %cst_191 [1] : vector<8x32xf32> to vector<8xf32>
    %266 = vector.shape_cast %265 : vector<8xf32> to vector<8x1xf32>
    %cst_192 = arith.constant 3.200000e+01 : f32
    %267 = vector.broadcast %cst_192 : f32 to vector<8x1xf32>
    %268 = arith.divf %266, %267 : vector<8x1xf32>
    %269 = vector.broadcast %261 : vector<8x1xf32> to vector<8x32xf32>
    %270 = arith.subf %253, %269 : vector<8x32xf32>
    %cst_193 = arith.constant 9.99999974E-6 : f32
    %271 = vector.broadcast %cst_193 : f32 to vector<8x1xf32>
    %272 = arith.addf %268, %271 : vector<8x1xf32>
    %273 = math.rsqrt %272 : vector<8x1xf32>
    %274 = vector.broadcast %273 : vector<8x1xf32> to vector<8x32xf32>
    %275 = arith.mulf %270, %274 : vector<8x32xf32>
    %276 = vector.broadcast %255 : vector<1x32xf32> to vector<8x32xf32>
    %277 = arith.mulf %275, %276 : vector<8x32xf32>
    %278 = vector.broadcast %257 : vector<1x32xf32> to vector<8x32xf32>
    %279 = arith.addf %277, %278 : vector<8x32xf32>
    %c0_194 = arith.constant 0 : index
    %c0_195 = arith.constant 0 : index
    %280 = vector.load %arg26[%c0_194, %c0_195] : memref<8x32xf32, #tpu.memory_space<vmem>>, vector<8x32xf32>
    tpu.vector_store %arg26[%c0_194, %c0_195], %279 {strides = array<i32>} : memref<8x32xf32, #tpu.memory_space<vmem>>, vector<8x32xf32>,
    %c1_i32 = arith.constant 1 : i32
    %281 = arith.cmpi eq, %arg1, %c1_i32 : i32
    %282 = arith.extui %281 : i1 to i32
    %c0_i32_196 = arith.constant 0 : i32
    %283 = arith.cmpi ne, %282, %c0_i32_196 : i32
    scf.if %283 {
      %284 = vector.extract_strided_slice %279 {offsets = [7, 0], sizes = [1, 32], strides = [1, 1]} : vector<8x32xf32> to vector<1x32xf32>
      %c0_197 = arith.constant 0 : index
      %c0_198 = arith.constant 0 : index
      %285 = vector.load %arg21[%c0_197, %c0_198] : memref<1x32xf32, #tpu.memory_space<vmem>>, vector<1x32xf32>
      %c0_199 = arith.constant 0 : index
      %c0_200 = arith.constant 0 : index
      %286 = vector.load %arg22[%c0_199, %c0_200] : memref<1x32xf32, #tpu.memory_space<vmem>>, vector<1x32xf32>
      %cst_201 = arith.constant dense<0.000000e+00> : vector<1xf32>
      %287 = vector.multi_reduction <add>, %284, %cst_201 [1] : vector<1x32xf32> to vector<1xf32>
      %288 = vector.shape_cast %287 : vector<1xf32> to vector<1x1xf32>
      %cst_202 = arith.constant 3.200000e+01 : f32
      %289 = vector.broadcast %cst_202 : f32 to vector<1x1xf32>
      %290 = arith.divf %288, %289 : vector<1x1xf32>
      %291 = vector.broadcast %290 : vector<1x1xf32> to vector<1x32xf32>
      %292 = arith.subf %284, %291 : vector<1x32xf32>
      %293 = arith.mulf %292, %292 : vector<1x32xf32>
      %cst_203 = arith.constant dense<0.000000e+00> : vector<1xf32>
      %294 = vector.multi_reduction <add>, %293, %cst_203 [1] : vector<1x32xf32> to vector<1xf32>
      %295 = vector.shape_cast %294 : vector<1xf32> to vector<1x1xf32>
      %cst_204 = arith.constant 3.200000e+01 : f32
      %296 = vector.broadcast %cst_204 : f32 to vector<1x1xf32>
      %297 = arith.divf %295, %296 : vector<1x1xf32>
      %298 = vector.broadcast %290 : vector<1x1xf32> to vector<1x32xf32>
      %299 = arith.subf %284, %298 : vector<1x32xf32>
      %cst_205 = arith.constant 9.99999974E-6 : f32
      %300 = vector.broadcast %cst_205 : f32 to vector<1x1xf32>
      %301 = arith.addf %297, %300 : vector<1x1xf32>
      %302 = math.rsqrt %301 : vector<1x1xf32>
      %303 = vector.broadcast %302 : vector<1x1xf32> to vector<1x32xf32>
      %304 = arith.mulf %299, %303 : vector<1x32xf32>
      %305 = arith.mulf %304, %285 : vector<1x32xf32>
      %306 = arith.addf %305, %286 : vector<1x32xf32>
      %c0_206 = arith.constant 0 : index
      %c0_207 = arith.constant 0 : index
      %307 = vector.load %arg23[%c0_206, %c0_207] : memref<32x4xf32, #tpu.memory_space<vmem>>, vector<32x4xf32>
      %cst_208 = arith.constant dense<0.000000e+00> : vector<1x4xf32>
      %308 = tpu.matmul %306, %307, %cst_208 {dimension_numbers = #tpu.dot_dimension_numbers<[1], [0], [0], [1], [0, 0, 1, 1], [], []>} : vector<1x32xf32>, vector<32x4xf32>, vector<1x4xf32> -> vector<1x4xf32>
      %c0_209 = arith.constant 0 : index
      %c0_210 = arith.constant 0 : index
      %309 = vector.load %arg24[%c0_209, %c0_210] : memref<1x4xf32, #tpu.memory_space<vmem>>, vector<1x4xf32>
      %310 = arith.addf %308, %309 : vector<1x4xf32>
      %c0_211 = arith.constant 0 : index
      %c0_212 = arith.constant 0 : index
      %c0_213 = arith.constant 0 : index
      %311 = vector.load %arg25[%c0_211, %c0_212, %c0_213] : memref<1x1x4xf32, #tpu.memory_space<vmem>>, vector<1x1x4xf32>
      %312 = vector.shape_cast %311 : vector<1x1x4xf32> to vector<1x4xf32>
      %313 = vector.shape_cast %310 : vector<1x4xf32> to vector<1x1x4xf32>
      tpu.vector_store %arg25[%c0_211, %c0_212, %c0_213], %313 {strides = array<i32>} : memref<1x1x4xf32, #tpu.memory_space<vmem>>, vector<1x1x4xf32>,
    } else {
    }
    return
  }
  func.func @transform_0(%arg0: i32, %arg1: i32) -> (i32, i32, i32) {
    %c0_i32 = arith.constant 0 : i32
    %c0_i32_0 = arith.constant 0 : i32
    %c0_i32_1 = arith.constant 0 : i32
    return %arg0, %c0_i32, %c0_i32_0 : i32, i32, i32
  }
  func.func @transform_1(%arg0: i32, %arg1: i32) -> (i32, i32, i32) {
    %c0_i32 = arith.constant 0 : i32
    %c0_i32_0 = arith.constant 0 : i32
    %c0_i32_1 = arith.constant 0 : i32
    %c0_i32_2 = arith.constant 0 : i32
    return %c0_i32, %c0_i32_0, %c0_i32_1 : i32, i32, i32
  }
  func.func @transform_2(%arg0: i32, %arg1: i32) -> (i32, i32) {
    %c0_i32 = arith.constant 0 : i32
    %c0_i32_0 = arith.constant 0 : i32
    %c0_i32_1 = arith.constant 0 : i32
    return %c0_i32, %c0_i32_0 : i32, i32
  }
  func.func @transform_3(%arg0: i32, %arg1: i32) -> (i32, i32, i32, i32) {
    %c0_i32 = arith.constant 0 : i32
    %c0_i32_0 = arith.constant 0 : i32
    %c0_i32_1 = arith.constant 0 : i32
    %c0_i32_2 = arith.constant 0 : i32
    return %arg1, %c0_i32, %c0_i32_0, %c0_i32_1 : i32, i32, i32, i32
  }
  func.func @transform_4(%arg0: i32, %arg1: i32) -> (i32, i32, i32, i32) {
    %c0_i32 = arith.constant 0 : i32
    %c0_i32_0 = arith.constant 0 : i32
    %c0_i32_1 = arith.constant 0 : i32
    %c0_i32_2 = arith.constant 0 : i32
    return %arg1, %c0_i32, %c0_i32_0, %c0_i32_1 : i32, i32, i32, i32
  }
  func.func @transform_5(%arg0: i32, %arg1: i32) -> (i32, i32, i32, i32) {
    %c0_i32 = arith.constant 0 : i32
    %c0_i32_0 = arith.constant 0 : i32
    %c0_i32_1 = arith.constant 0 : i32
    %c0_i32_2 = arith.constant 0 : i32
    return %arg1, %c0_i32, %c0_i32_0, %c0_i32_1 : i32, i32, i32, i32
  }
  func.func @transform_6(%arg0: i32, %arg1: i32) -> (i32, i32, i32, i32) {
    %c0_i32 = arith.constant 0 : i32
    %c0_i32_0 = arith.constant 0 : i32
    %c0_i32_1 = arith.constant 0 : i32
    %c0_i32_2 = arith.constant 0 : i32
    return %arg1, %c0_i32, %c0_i32_0, %c0_i32_1 : i32, i32, i32, i32
  }
  func.func @transform_7(%arg0: i32, %arg1: i32) -> (i32, i32, i32, i32) {
    %c0_i32 = arith.constant 0 : i32
    %c0_i32_0 = arith.constant 0 : i32
    %c0_i32_1 = arith.constant 0 : i32
    %c0_i32_2 = arith.constant 0 : i32
    return %arg1, %c0_i32, %c0_i32_0, %c0_i32_1 : i32, i32, i32, i32
  }
  func.func @transform_8(%arg0: i32, %arg1: i32) -> (i32, i32, i32, i32) {
    %c0_i32 = arith.constant 0 : i32
    %c0_i32_0 = arith.constant 0 : i32
    %c0_i32_1 = arith.constant 0 : i32
    %c0_i32_2 = arith.constant 0 : i32
    return %arg1, %c0_i32, %c0_i32_0, %c0_i32_1 : i32, i32, i32, i32
  }
  func.func @transform_9(%arg0: i32, %arg1: i32) -> (i32, i32, i32, i32) {
    %c0_i32 = arith.constant 0 : i32
    %c0_i32_0 = arith.constant 0 : i32
    %c0_i32_1 = arith.constant 0 : i32
    %c0_i32_2 = arith.constant 0 : i32
    return %arg1, %c0_i32, %c0_i32_0, %c0_i32_1 : i32, i32, i32, i32
  }
  func.func @transform_10(%arg0: i32, %arg1: i32) -> (i32, i32, i32) {
    %c0_i32 = arith.constant 0 : i32
    %c0_i32_0 = arith.constant 0 : i32
    %c0_i32_1 = arith.constant 0 : i32
    return %arg1, %c0_i32, %c0_i32_0 : i32, i32, i32
  }
  func.func @transform_11(%arg0: i32, %arg1: i32) -> (i32, i32, i32) {
    %c0_i32 = arith.constant 0 : i32
    %c0_i32_0 = arith.constant 0 : i32
    %c0_i32_1 = arith.constant 0 : i32
    return %arg1, %c0_i32, %c0_i32_0 : i32, i32, i32
  }
  func.func @transform_12(%arg0: i32, %arg1: i32) -> (i32, i32, i32) {
    %c0_i32 = arith.constant 0 : i32
    %c0_i32_0 = arith.constant 0 : i32
    %c0_i32_1 = arith.constant 0 : i32
    return %arg1, %c0_i32, %c0_i32_0 : i32, i32, i32
  }
  func.func @transform_13(%arg0: i32, %arg1: i32) -> (i32, i32, i32) {
    %c0_i32 = arith.constant 0 : i32
    %c0_i32_0 = arith.constant 0 : i32
    %c0_i32_1 = arith.constant 0 : i32
    return %arg1, %c0_i32, %c0_i32_0 : i32, i32, i32
  }
  func.func @transform_14(%arg0: i32, %arg1: i32) -> (i32, i32, i32) {
    %c0_i32 = arith.constant 0 : i32
    %c0_i32_0 = arith.constant 0 : i32
    %c0_i32_1 = arith.constant 0 : i32
    return %arg1, %c0_i32, %c0_i32_0 : i32, i32, i32
  }
  func.func @transform_15(%arg0: i32, %arg1: i32) -> (i32, i32, i32) {
    %c0_i32 = arith.constant 0 : i32
    %c0_i32_0 = arith.constant 0 : i32
    %c0_i32_1 = arith.constant 0 : i32
    return %arg1, %c0_i32, %c0_i32_0 : i32, i32, i32
  }
  func.func @transform_16(%arg0: i32, %arg1: i32) -> (i32, i32, i32) {
    %c0_i32 = arith.constant 0 : i32
    %c0_i32_0 = arith.constant 0 : i32
    %c0_i32_1 = arith.constant 0 : i32
    return %arg1, %c0_i32, %c0_i32_0 : i32, i32, i32
  }
  func.func @transform_17(%arg0: i32, %arg1: i32) -> (i32, i32, i32) {
    %c0_i32 = arith.constant 0 : i32
    %c0_i32_0 = arith.constant 0 : i32
    %c0_i32_1 = arith.constant 0 : i32
    return %arg1, %c0_i32, %c0_i32_0 : i32, i32, i32
  }
  func.func @transform_18(%arg0: i32, %arg1: i32) -> (i32, i32, i32) {
    %c0_i32 = arith.constant 0 : i32
    %c0_i32_0 = arith.constant 0 : i32
    %c0_i32_1 = arith.constant 0 : i32
    return %arg1, %c0_i32, %c0_i32_0 : i32, i32, i32
  }
  func.func @transform_19(%arg0: i32, %arg1: i32) -> (i32, i32) {
    %c0_i32 = arith.constant 0 : i32
    %c0_i32_0 = arith.constant 0 : i32
    %c0_i32_1 = arith.constant 0 : i32
    return %c0_i32, %c0_i32_0 : i32, i32
  }
  func.func @transform_20(%arg0: i32, %arg1: i32) -> (i32, i32) {
    %c0_i32 = arith.constant 0 : i32
    %c0_i32_0 = arith.constant 0 : i32
    %c0_i32_1 = arith.constant 0 : i32
    return %c0_i32, %c0_i32_0 : i32, i32
  }
  func.func @transform_21(%arg0: i32, %arg1: i32) -> (i32, i32) {
    %c0_i32 = arith.constant 0 : i32
    %c0_i32_0 = arith.constant 0 : i32
    %c0_i32_1 = arith.constant 0 : i32
    return %c0_i32, %c0_i32_0 : i32, i32
  }
  func.func @transform_22(%arg0: i32, %arg1: i32) -> (i32, i32) {
    %c0_i32 = arith.constant 0 : i32
    %c0_i32_0 = arith.constant 0 : i32
    %c0_i32_1 = arith.constant 0 : i32
    return %c0_i32, %c0_i32_0 : i32, i32
  }
  func.func @transform_23(%arg0: i32, %arg1: i32) -> (i32, i32, i32) {
    %c0_i32 = arith.constant 0 : i32
    %c0_i32_0 = arith.constant 0 : i32
    %c0_i32_1 = arith.constant 0 : i32
    return %arg0, %c0_i32, %c0_i32_0 : i32, i32, i32
  }
}

</mosaic_0001>

<bundles_post_ra>
// kernel: tpu_custom_call.1
= control target key start
LH: loop header
LB: loop body
LE: loop exit
PB: predicated region body
PF: predicated region fallthrough
CT: control target
= control target key end

     0   :  { %s4791_s0 = inlined_call_operand.vmem [shape: f32[2,8,4], index: 0, kind: input, shape index: {}]   ;;  %s4792_s1 = inlined_call_operand.vmem [shape: f32[3,4,32], index: 1, kind: input, shape index: {}]   ;;  %s4793_s2 = inlined_call_operand.vmem [shape: f32[8,32], index: 2, kind: input, shape index: {}]   ;;  %s4794_s3 = inlined_call_operand.vmem [shape: bf16[2,4,32,8], index: 3, kind: input, shape index: {}]   ;;  %s4795_s4 = inlined_call_operand.vmem [shape: f32[2,4,1,8], index: 4, kind: input, shape index: {}]   ;;  %s4796_s5 = inlined_call_operand.vmem [shape: bf16[2,4,32,8], index: 5, kind: input, shape index: {}]   ;;  %s4797_s6 = inlined_call_operand.vmem [shape: f32[2,4,1,8], index: 6, kind: input, shape index: {}]   ;;  %s4798_s7 = inlined_call_operand.vmem [shape: bf16[2,4,32,8], index: 7, kind: input, shape index: {}]   ;;  %s4799_s8 = inlined_call_operand.vmem [shape: f32[2,4,1,8], index: 8, kind: input, shape index: {}]   ;;  %s4800_s9 = inlined_call_operand.vmem [shape: bf16[2,4,8,32], index: 9, kind: input, shape index: {}]   ;;  %s4801_s10 = inlined_call_operand.vmem [shape: f32[2,1,32], index: 10, kind: input, shape index: {}]   ;;  %s4802_s11 = inlined_call_operand.vmem [shape: bf16[2,32,64], index: 11, kind: input, shape index: {}]   ;;  %s4803_s12 = inlined_call_operand.vmem [shape: f32[2,1,64], index: 12, kind: input, shape index: {}]   ;;  %s4804_s13 = inlined_call_operand.vmem [shape: bf16[2,64,32], index: 13, kind: input, shape index: {}]   ;;  %s4805_s14 = inlined_call_operand.vmem [shape: f32[2,1,32], index: 14, kind: input, shape index: {}]   ;;  %s4806_s15 = inlined_call_operand.vmem [shape: f32[2,1,32], index: 15, kind: input, shape index: {}]   ;;  %s4807_s16 = inlined_call_operand.vmem [shape: f32[2,1,32], index: 16, kind: input, shape index: {}]   ;;  %s4808_s17 = inlined_call_operand.vmem [shape: f32[2,1,32], index: 17, kind: input, shape index: {}]   ;;  %s4809_s18 = inlined_call_operand.vmem [shape: f32[2,1,32], index: 18, kind: input, shape index: {}]   ;;  %s4810_s19 = inlined_call_operand.vmem [shape: f32[1,32], index: 19, kind: input, shape index: {}]   ;;  %s4811_s20 = inlined_call_operand.vmem [shape: f32[1,32], index: 20, kind: input, shape index: {}]   ;;  %s4812_s21 = inlined_call_operand.vmem [shape: f32[32,4], index: 21, kind: input, shape index: {}]   ;;  %s4813_s22 = inlined_call_operand.vmem [shape: f32[1,4], index: 22, kind: input, shape index: {}]   ;;  %s4814_s23 = inlined_call_operand.hbm [shape: f32[2,1,4], index: 23, kind: output, shape index: {}]  }
   0x1   :  { %4834 = sst [smem:[#allocation22_spill]] %s4791_s0 }
   0x2   :  { %4835 = sst [smem:[#allocation23_spill]] %s4792_s1 }
   0x3   :  { %4836 = sst [smem:[#allocation24_spill]] %s4793_s2 }
   0x4   :  { %4837 = sst [smem:[#allocation25_spill]] %s4794_s3 }
   0x5   :  { %4838 = sst [smem:[#allocation26_spill]] %s4795_s4 }
   0x6   :  { %4839 = sst [smem:[#allocation27_spill]] %s4796_s5 }
   0x7   :  { %4840 = sst [smem:[#allocation28_spill]] %s4797_s6 }
   0x8   :  { %4841 = sst [smem:[#allocation29_spill]] %s4798_s7 }
   0x9   :  { %4842 = sst [smem:[#allocation30_spill]] %s4799_s8 }
   0xa   :  { %4843 = sst [smem:[#allocation31_spill]] %s4800_s9 }
   0xb   :  { %4844 = sst [smem:[#allocation32_spill]] %s4802_s11 }
   0xc   :  { %4845 = sst [smem:[#allocation33_spill]] %s4805_s14 }
   0xd   :  { %4846 = sst [smem:[#allocation34_spill]] %s4809_s18 }
   0xe   :  { %4847 = sst [smem:[#allocation35_spill]] %s4810_s19 }
   0xf   :  { %4848 = sst [smem:[#allocation36_spill]] %s4811_s20 }
  0x10   :  { %4849 = sst [smem:[#allocation37_spill]] %s4812_s21 }
  0x11   :  { %4850 = sst [smem:[#allocation38_spill]] %s4813_s22 }
  0x12   :  { %4851 = sst [smem:[#allocation39_spill]] %s4814_s23 }
  0x13   :  { %28 = vsyncpa [#allocation4], 0 }
  0x14   :  { %30 = vsyncpa [#allocation4 + $0x1], 0  ;;  %s4250_s4 = smov 0   ;;  %s4252_s30 = smov 0  }
  0x15   :  { %s4254_s24 = smov 0   ;;  %s4256_s25 = smov 0  }
  0x16   :  { %s4258_s5 = smov 0   ;;  %s4260_s1 = smov 0  }
  0x17   :  { %s4262_s26 = smov 0   ;;  %s4264_s2 = smov 0  }
  0x18 LB: > { %4852 = sst [smem:[#allocation6_spill]] %s4092_s4  ;;  %s3410_s6 = sadd.s32 4294967295, %s4120_s2   ;;  %s4120_s2 = sphi %s4264_s2, %s36_s2   ;;  %s4116_s26 = sphi %s4262_s26, %s4911_s26   ;;  %s4112_s1 = sphi %s4260_s1, %s4910_s1   ;;  %s4108_s5 = sphi %s4258_s5, %s4909_s5   ;;  %s4104_s25 = sphi %s4256_s25, %s4908_s25   ;;  %s4100_s24 = sphi %s4254_s24, %s4907_s24   ;;  %s4096_s30 = sphi %s4252_s30, %s4913_s30   ;;  %s4092_s4 = sphi %s4250_s4, %s4912_s4  }
  0x19   : > { %4853 = sst [smem:[#allocation7_spill]] %s4100_s24  ;;  %s3411_s27 = sadd.s32 4294967294, %s4120_s2  }
  0x1a   : > { %4854 = sst [smem:[#allocation8_spill]] %s4104_s25  ;;  %s45_s7 = sadd.s32 1, %s4112_s1 }
  0x1b   : > { %4855 = sst [smem:[#allocation9_spill]] %s4108_s5  ;;  %p46_p0 = scmp.ge.s32.totalorder %s45_s7, 2 }
  0x1c   : > { %4856 = sst [smem:[#allocation10_spill]] %s4112_s1  ;;  %s48_s28 = sadd.s32 1, %s4116_s26 }
  0x1d   : > { %4857 = sst [smem:[#allocation11_spill]] %s4116_s26  ;;  %p633_p1 = scmp.ne.s32.totalorder %s4100_s24, %s4096_s30 }
  0x1e   : > { %4858 = sst [smem:[#allocation12_spill]] %s4120_s2  ;;  %p634_p2 = scmp.eq.s32.totalorder %s3410_s6, 3 }
  0x1f   : > { %s4915_s7 = smov (%p46_p0, %s45_s7), 0  ;;  %s4917_s28 = smov (!%p46_p0, %s48_s28), %s4116_s26 }
  0x20   : > { %4859 = sst [smem:[#allocation13_spill]] %s4915_s7  ;;  %p4299_p3 = por %p634_p2, %p633_p1 }
  0x21   : > { %p639_p4 = scmp.ne.s32.totalorder %s4096_s30, %s4092_s4  ;;  %p50_p5 = scmp.ge.s32.totalorder %s4917_s28, 2 }
  0x22   : > { %s4860_s29 = scalar_select %p4299_p3, 1, 0 }
  0x23   : > { %p640_p6 = scmp.eq.s32.totalorder %s3411_s27, 3  ;;  %p3414_p7 = scmp.ge.s32.totalorder %s4120_s2, 1 }
  0x24   : > { %4861 = sst [smem:[#allocation14_spill]] %s4860_s29  ;;  %p794_p8 = scmp.lt.s32.totalorder %s4120_s2, 5 }
  0x25   : > { %s4919_s28 = smov (%p50_p5, %s4917_s28), 0  ;;  %p4309_p9 = por %p640_p6, %p639_p4 }
  0x26   : > { %4862 = sst [smem:[#allocation15_spill]] %s4919_s28  ;;  %p795_p10 = pnand %p3414_p7, %p794_p8 }
  0x27   : > { %s4863_s3 = scalar_select %p4309_p9, 1, 0 }
  0x28   : > { %s620_s0 = ssub.s32 %s4116_s26, %s4919_s28  ;;  %s623_s6 = sadd.s32 1, %s4100_s24 }
  0x29   : > { %4864 = sst [smem:[#allocation16_spill]] %s4863_s3  ;;  %p621_p11 = scmp.eq.s32.totalorder %s620_s0, 0 }
  0x2a   : > { %798 = sbr.rel (%p795_p10) target bundleno = 6057 (0x17a9), region = 112 }
  0x2b   : > { %s4317_s7 = scalar_select %p621_p11, %s4100_s24, %s623_s6  }
  0x2d   : > { %4865 = sst [smem:[#allocation17_spill]] %s4317_s7 }
  0x31   : > { %p919_p12 = scmp.lt.s32.totalorder %s4108_s5, 1  ;;  %v987_v0 = vlaneseq  ;;  %p923_p13 = scmp.lt.s32.totalorder %s4104_s25, 1 }
  0x32   : > { %s4866_s27 = sld [smem:[#allocation22_spill]]  ;;  %s4867_s2 = sld [smem:[#allocation25_spill]] }
  0x33   : > { %s920_s1 = scalar_select %p919_p12, %s4108_s5, 1  ;;  %v4323_v1 = vshrl.u32 %v987_v0, 7  ;;  %v4325_v2 = vand.u32 127, %v987_v0 }
  0x34   : > { %s4328_s28 = scalar_select %p923_p13, %s4104_s25, 1 }
  0x35   : > { %s3415_s0 = sshll.u32 %s920_s1, 3  ;;  %s4869_s20 = sld [smem:[#allocation26_spill]] }
  0x36   : > { %s3575_s24 = sshll.u32 %s4328_s28, 6  ;;  %s3418_s29 = sshll.u32 %s4328_s28, 2 }
  0x37   : > { %s4871_s26 = sld [smem:[#allocation27_spill]]  ;;  %s4873_s4 = sld [smem:[#allocation28_spill]] }
  0x38   : > { %s922_s7 = scalar_lea.vmem %s4866_s27, %s3415_s0  ;;  %s4337_s23 = scalar_lea.vmem %s4867_s2, %s3575_s24 }
  0x39   : > { %4868 = sst [smem:[#allocation18_spill]] %s4337_s23  ;;  %s4875_s25 = sld [smem:[#allocation29_spill]] }
  0x3a   : > { %s4876_s8 = sld [smem:[#allocation30_spill]]  ;;  %s3578_s21 = sshll.u32 %s4328_s28, 4 }
  0x3b   : > { %s4343_s19 = scalar_lea.vmem %s4869_s20, %s3418_s29  ;;  %s4877_s9 = sld [smem:[#allocation31_spill]] }
  0x3c   : > { %4870 = sst [smem:[#allocation19_spill]] %s4343_s19  ;;  %s4878_s11 = sld [smem:[#allocation32_spill]] }
  0x3d   : > { %s4348_s27 = scalar_lea.vmem %s4871_s26, %s3575_s24  ;;  %s4353_s2 = scalar_lea.vmem %s4873_s4, %s3418_s29 }
  0x3e   : > { %4872 = sst [smem:[#allocation20_spill]] %s4348_s27  ;;  %s3580_s3 = sshll.u32 %s4328_s28, 5 }
  0x3f   : > { %4874 = sst [smem:[#allocation21_spill]] %s4353_s2  ;;  %s4358_s18 = scalar_lea.vmem %s4875_s25, %s3575_s24 }
  0x40   : > { %s4363_s5 = scalar_lea.vmem %s4876_s8, %s3418_s29  ;;  %s976_s27 = scalar_lea.vmem %s4806_s15, %s4328_s28 }
  0x41   : > { %s4369_s19 = scalar_lea.vmem %s4877_s9, %s3578_s21  ;;  %s4392_s9 = scalar_lea.vmem %s4804_s13, %s3580_s3 }
  0x42   : > { %s4378_s23 = scalar_lea.vmem %s4878_s11, %s3578_s21  ;;  %s979_s4 = scalar_lea.vmem %s4807_s16, %s4328_s28 }
  0x43   : > { %s982_s29 = scalar_lea.vmem %s4808_s17, %s4328_s28  ;;  %s4880_s20 = sld [smem:[#allocation34_spill]] }
  0x44   : > { %s4881_s14 = sand.u32 1, %s4096_s30   ;;  %s4882_s3 = sld [smem:[#allocation8_spill]] }
  0x45   : > { %s4412_s8 = scalar_lea.vmem [#allocation3], %s4881_s14 }
  0x49   : > { %s985_s1 = scalar_lea.vmem %s4880_s20, %s4328_s28 }
  0x4a   : > { %p3431_p0 = scmp.ne.s32.totalorder %s4882_s3, 0 }
  0x4b   : > { %v995_v3 = vld [vmem:[%s922_s7] sm:$0xff] (!%p3431_p0)  ;;  %v3432_v4 = vadd.s32 (!%p3431_p0), 4294967295, %v4323_v1  ;;  %vm998_vm0 = vcmp.eq.s32.totalorder (!%p3431_p0), %v4323_v1, 0  ;;  %v4122_v5 = vmov (!%p3431_p0), 0.0   ;;  %vm4123_vm1 = vmmov (!%p3431_p0), 0   ;;  %s4883_s7 = sld [smem:[#allocation23_spill]] (!%p3431_p0) }
  0x4c   : > { %994 = sbr.rel (%p3431_p0) target bundleno = 511 (0x1ff), region = 116  ;;  %3664 = vmatprep.subr.mxu0 (!%p3431_p0), %v4122_v5  ;;  %3666 = vmatprep.mubr.msk.f32.mxu0 (!%p3431_p0), %vm4123_vm1, %v4122_v5  ;;  %vm999_vm2 = vcmp.eq.s32.totalorder (!%p3431_p0), %v4325_v2, 7  ;;  %v1004_v6 = vadd.s32 (!%p3431_p0), 1, %v4323_v1  ;;  %vm1006_vm3 = vcmp.eq.s32.totalorder (!%p3431_p0), %v4323_v1, 7  ;;  %vm1012_vm6 = vcmask (!%p3431_p0), 64512   ;;  %s4884_s25 = sld [smem:[#allocation24_spill]] (!%p3431_p0) }
  0x4d   : > { %3665 = vmatpush3.msra.mxu0 (!%p3431_p0), %v995_v3  ;;  %3669 = vmatprep.subr.mxu1 (!%p3431_p0), %v4122_v5  ;;  %vm997_vm4 = vcmp.eq.s32.totalorder (!%p3431_p0), %v4325_v2, %v3432_v4  ;;  %vm1000_vm5 = vmand (!%p3431_p0), %vm998_vm0, %vm999_vm2  ;;  %vm1007_vm7 = vcmp.eq.s32.totalorder (!%p3431_p0), %v4325_v2, 0  ;;  %vm1166_vm10 = vcmask (!%p3431_p0), 1043456   ;;  %vm1162_vm13 = vcmask (!%p3431_p0), 31744  }
  0x4e   : > { %vm1001_vm8 = vmor (!%p3431_p0), %vm997_vm4, %vm1000_vm5  ;;  %3670 = vmatpush3.msra.mxu1 (!%p3431_p0), %v995_v3  ;;  %3671 = vmatprep.mubr.msk.f32.mxu1 (!%p3431_p0), %vm4123_vm1, %v4122_v5  ;;  %vm1005_vm9 = vcmp.eq.s32.totalorder (!%p3431_p0), %v4325_v2, %v1004_v6  ;;  %vm1397_vm14 = vcmask (!%p3431_p0), 261120  }
  0x4f   : > { %v3433_v8 = vsel (!%p3431_p0), %vm1001_vm8, 1.0, %v4122_v5  ;;  %vm1008_vm11 = vmand (!%p3431_p0), %vm1006_vm3, %vm1007_vm7  ;;  %3674 = vmatprep.subr.mxu0 (!%p3431_p0), %v4122_v5  ;;  %3679 = vmatprep.subr.mxu1 (!%p3431_p0), %v4122_v5 }
  0x50   : > { %3667 = vmatmul.mubr.msk.f32.vlgmr.msra.gmra.mrb[0].mxu0 (!%p3431_p0), %vm1012_vm6, %v3433_v8  ;;  %vm1009_vm12 = vmor (!%p3431_p0), %vm1005_vm9, %vm1008_vm11 }
  0x51   : > { %v3437_v7 = vld [vmem:[%s4883_s7 + $0x4] sm:$0xf] (!%p3431_p0)  ;;  %v1159_v9 = vld [vmem:[%s4883_s7] sm:$0xf] (!%p3431_p0)  ;;  %v3434_v10 = vsel (!%p3431_p0), %vm1009_vm12, 1.0, %v4122_v5  ;;  %3676 = vmatprep.mubr.msk.f32.mxu0 (!%p3431_p0), %vm4123_vm1, %v4122_v5 }
  0x52   : > { %3675 = vmatpush3.msk.msra.mxu0 (!%p3431_p0), %vm1166_vm10, %v3437_v7  ;;  %3672 = vmatmul.mubr.msk.f32.vlgmr.msra.gmra.mrb[0].mxu1 (!%p3431_p0), %vm1012_vm6, %v3434_v10  ;;  %v3442_v11 = vld [vmem:[%s4883_s7 + $0x8] sm:$0xf] (!%p3431_p0)  ;;  %v1395_v22 = vld [vmem:[%s4884_s25] sm:$0xff] (!%p3431_p0) }
  0x53   : > { %3684 = vmatprep.subr.mxu0 %v4122_v5  ;;  %3680 = vmatpush3.msk.msra.mxu1 %vm1166_vm10, %v1159_v9 }
  0x54   : > { %3681 = vmatprep.mubr.msk.f32.mxu1 %vm4123_vm1, %v4122_v5  ;;  %3677 = vmatmul.mubr.msk.f32.vlgmr.msra.gmra.mrb[2].mxu0 %vm1162_vm13, %v995_v3 }
  0x55   : > { %3685 = vmatpush3.msk.msra.mxu0 %vm1166_vm10, %v3442_v11  ;;  %3686 = vmatprep.mubr.msk.f32.mxu0 %vm4123_vm1, %v4122_v5 }
 0x123   : > { %v1082_v12 = vpop.f32.mrb[0].mxu0 }
 0x124   : > { %v3668_v13 = vpop.f32.mrb[1].mxu0  ;;  %3682 = vmatmul.mubr.msk.f32.vlgmr.msra.gmra.mrb[2].mxu1 %vm1162_vm13, %v1082_v12 }
 0x125   : > { %v1155_v14 = vpop.f32.mrb[0].mxu1 }
 0x126   : > { %v3673_v15 = vpop.f32.mrb[1].mxu1  ;;  %3687 = vmatmul.mubr.msk.f32.vlgmr.msra.gmra.mrb[4].mxu0 %vm1162_vm13, %v1155_v14 }
 0x127   : > { %v1236_v16 = vpop.f32.mrb[2].mxu0 }
 0x128   : > { %v3678_v17 = vpop.f32.mrb[3].mxu0 }
 0x1f7   : > { %v1312_v18 = vpop.f32.mrb[2].mxu1 }
 0x1f8   : > { %v1313_v19 = vadd.f32 %v1312_v18, %v1236_v16  ;;  %v3683_v20 = vpop.f32.mrb[3].mxu1 }
 0x1f9   : > { %v1390_v21 = vpop.f32.mrb[4].mxu0 }
 0x1fa   : > { %v1394_v23 = vadd.f32 %v1390_v21, %v1313_v19  ;;  %v3688_v24 = vpop.f32.mrb[5].mxu0 }
 0x1fc   : > { %v1396_v25 = vadd.f32 %v1395_v22, %v1394_v23 }
 0x1fe   : > { %1398 = vst.msk [vmem:[#allocation2] sm:$0xff] %vm1397_vm14, %v1396_v25 }
 0x1ff PF: > { %s4885_s22 = sld [smem:[#allocation20_spill]]  ;;  %s4886_s20 = sld [smem:[#allocation18_spill]]  ;;  %v4124_v27 = vmov 0.0   ;;  %vm4125_vm15 = vmmov 0   ;;  %vm1425_vm0 = vcmask 261120   ;;  %vm1598_vm1 = vcmask 64512  }
 0x200   : > { %3697 = vmatprep.subr.bf16.mxu1 %v4124_v27  ;;  %3689 = vmatprep.subr.bf16.mxu0 %v4124_v27  ;;  %s4887_s3 = sld [smem:[#allocation21_spill]]  ;;  %s4888_s11 = sld [smem:[#allocation19_spill]]  ;;  %v3976_v49 = vld [vmem:[%s4358_s18] sm:$0xff]   ;;  %v3977_v50 = vld [vmem:[%s4358_s18 + $0x8] sm:$0xff]   ;;  %vm1401_vm2 = vcmp.ge.s32.totalorder %v4323_v1, %v4325_v2  ;;  %vm1662_vm3 = vcmask 1043456   ;;  %vm2970_vm4 = vcmask 523264  }
 0x201   : > { %3701 = vmatprep.mubr.msk.bf16.mxu1 %vm4125_vm15, %v4124_v27  ;;  %3693 = vmatprep.mubr.msk.bf16.mxu0 %vm4125_vm15, %v4124_v27  ;;  %v3453_v3 = vld [vmem:[%s4363_s5] ss:$0 sm:$0xff]  ;;  %v3545_v2 = vld [vmem:[%s4363_s5 + $0x3] ss:$0 sm:$0xff]  ;;  %s4891_s21 = sld [smem:[#allocation33_spill]] }
 0x205   : > { %v3972_v26 = vld [vmem:[%s4885_s22] sm:$0xff]   ;;  %v3974_v29 = vld [vmem:[%s4885_s22 + $0x8] sm:$0xff]   ;;  %v3979_v8 = vld [vmem:[%s4886_s20 + $0x10] sm:$0xff]  }
 0x206   : > { %v3973_v28 = vld [vmem:[%s4886_s20] sm:$0xff]   ;;  %3698 = vmatpush3.bf16.msra.mxu1 %v3972_v26  ;;  %v3975_v30 = vld [vmem:[%s4886_s20 + $0x8] sm:$0xff]   ;;  %v3981_v9 = vld [vmem:[%s4886_s20 + $0x18] sm:$0xff]  }
 0x207   : > { %3690 = vmatpush3.bf16.msra.mxu0 %v3973_v28  ;;  %3699 = vmatprep.subr.bf16.mxu1 %v4124_v27  ;;  %v4455_v31 = vld [vmem:[#allocation2] sm:$0xff]  ;;  %v3978_v13 = vld [vmem:[%s4885_s22 + $0x10] sm:$0xff]   ;;  %v3980_v15 = vld [vmem:[%s4885_s22 + $0x18] sm:$0xff]   ;;  %s4892_s24 = scalar_lea.vmem %s4891_s21, %s4328_s28 }
 0x208   : > { %3691 = vmatprep.subr.bf16.mxu0 %v4124_v27  ;;  %v4461_v32 = vpack.c.bf16 %v4455_v31, %v4455_v31  ;;  %v3449_v33 = vld [vmem:[%s4887_s3] ss:$0 sm:$0xff]  ;;  %v3473_v24 = vld [vmem:[%s4887_s3 + $0x1] ss:$0 sm:$0xff] }
 0x209   : > { %v3445_v34 = vld [vmem:[%s4888_s11] ss:$0 sm:$0xff]  ;;  %v3464_v25 = vld [vmem:[%s4888_s11 + $0x1] ss:$0 sm:$0xff] }
 0x20a   : > { %3700 = vmatpush3.bf16.msra.mxu1 %v3974_v29 }
 0x20b   : > { %3692 = vmatpush3.bf16.msra.mxu0 %v3975_v30  ;;  %3713 = vmatprep.subr.bf16.mxu1 %v4124_v27 }
 0x20c   : > { %3705 = vmatprep.subr.bf16.mxu0 %v4124_v27 }
 0x20d   : > { %3702 = vmatmul.mubr.msk.bf16.vlgmr.msra.gmra.mrb[0].mxu1 %vm1425_vm0, %v4461_v32 }
 0x20e   : > { %3694 = vmatmul.mubr.msk.bf16.vlgmr.msra.gmra.mrb[0].mxu0 %vm1425_vm0, %v4461_v32  ;;  %3715 = vmatprep.mubr.msk.bf16.mxu1 %vm4125_vm15, %v4124_v27 }
 0x20f   : > { %3709 = vmatprep.mubr.msk.bf16.mxu0 %vm4125_vm15, %v4124_v27  ;;  %3706 = vmatpush3.bf16.msra.mxu0 %v3976_v49 }
 0x210   : > { %3707 = vmatprep.subr.bf16.mxu0 %v4124_v27 }
 0x213   : > { %3708 = vmatpush3.bf16.msra.mxu0 %v3977_v50 }
 0x214   : > { %3719 = vmatprep.subr.bf16.mxu0 %v4124_v27 }
 0x216   : > { %3710 = vmatmul.mubr.msk.bf16.vlgmr.msra.gmra.mrb[4].mxu0 %vm1425_vm0, %v4461_v32 }
 0x217   : > { %3721 = vmatprep.mubr.msk.bf16.mxu0 %vm4125_vm15, %v4124_v27 }
 0x2e0   : > { %v1527_v35 = vpop.f32.mrb[0].mxu1 }
 0x2e1   : > { %v1528_v36 = vadd.f32 %v3449_v33, %v1527_v35  ;;  %v3703_v37 = vpop.f32.mrb[1].mxu1  ;;  %v1463_v38 = vpop.f32.mrb[0].mxu0 }
 0x2e2   : > { %v1530_v39 = vpop.f32.mrb[2].mxu1  ;;  %v1464_v40 = vadd.f32 %v3445_v34, %v1463_v38  ;;  %v3695_v41 = vpop.f32.mrb[1].mxu0 }
 0x2e3   : > { %v1597_v42 = vpack.c.bf16 %v1528_v36, %v1528_v36  ;;  %v3704_v43 = vpop.f32.mrb[3].mxu1  ;;  %v1466_v44 = vpop.f32.mrb[2].mxu0  ;;  %v3982_v39 = vld [vmem:[%s4358_s18 + $0x10] sm:$0xff]  }
 0x2e4   : > { %v3696_v45 = vpop.f32.mrb[3].mxu0  ;;  %v1469_v47 = vmul.f32 0.35355338, %v1464_v40  ;;  %v3983_v40 = vld [vmem:[%s4358_s18 + $0x18] sm:$0xff]  }
 0x2e5   : > { %v1603_v46 = vsel %vm1598_vm1, %v1597_v42, 0 }
 0x2e6   : > { %3714 = vmatpush3.bf16.xpose.msra.mxu1 %v1603_v46  ;;  %v1596_v48 = vpack.c.bf16 %v1469_v47, %v1469_v47  ;;  %v3482_v47 = vld [vmem:[%s4363_s5 + $0x1] ss:$0 sm:$0xff] }
 0x2e7   : > { %3725 = vmatprep.subr.bf16.mxu1 %v4124_v27 }
 0x2e9   : > { %v1590_v62 = vpop.f32.mrb[4].mxu0 }
 0x2ea   : > { %v3711_v63 = vpop.f32.mrb[5].mxu0  ;;  %v1591_v5 = vadd.f32 %v3453_v3, %v1590_v62 }
 0x2eb   : > { %v1593_v0 = vpop.f32.mrb[6].mxu0 }
 0x2ec   : > { %v3712_v4 = vpop.f32.mrb[7].mxu0  ;;  %v1658_v6 = vpack.c.bf16 %v1591_v5, %v1591_v5  ;;  %v1707_v0 = vld [vmem:[%s4369_s19] sm:$0xf] }
 0x2ed   : > { %3716 = vmatmul.mubr.msk.bf16.vlgmr.msra.gmra.mrb[4].mxu1 %vm1598_vm1, %v1596_v48  ;;  %v2065_v5 = vsel %vm1662_vm3, %v1707_v0, 0 }
 0x2ee   : > { %3729 = vmatprep.mubr.msk.bf16.mxu1 %vm4125_vm15, %v4124_v27  ;;  %v1664_v7 = vsel %vm1662_vm3, %v1658_v6, 0  ;;  %3726 = vmatpush3.bf16.msra.mxu1 %v3979_v8  ;;  %v3984_v6 = vld [vmem:[%s4885_s22 + $0x20] sm:$0xff]   ;;  %v3985_v8 = vld [vmem:[%s4885_s22 + $0x28] sm:$0xff]  }
 0x2ef   : > { %3720 = vmatpush3.bf16.msra.mxu0 %v1664_v7  ;;  %3727 = vmatprep.subr.bf16.mxu1 %v4124_v27 }
 0x2f0   : > { %3733 = vmatprep.subr.bf16.mxu0 %v4124_v27 }
 0x2f2   : > { %3728 = vmatpush3.bf16.msra.mxu1 %v3981_v9 }
 0x2f3   : > { %3741 = vmatprep.subr.bf16.mxu1 %v4124_v27 }
 0x2f5   : > { %3730 = vmatmul.mubr.msk.bf16.vlgmr.msra.gmra.mrb[8].mxu1 %vm1425_vm0, %v4461_v32 }
 0x2f6   : > { %3745 = vmatprep.mubr.msk.bf16.mxu1 %vm4125_vm15, %v4124_v27  ;;  %3742 = vmatpush3.bf16.msra.mxu1 %v3982_v39 }
 0x2f7   : > { %3743 = vmatprep.subr.bf16.mxu1 %v4124_v27 }
 0x2fa   : > { %3744 = vmatpush3.bf16.msra.mxu1 %v3983_v40 }
 0x2fb   : > { %3755 = vmatprep.subr.bf16.mxu1 %v4124_v27 }
 0x2fd   : > { %3746 = vmatmul.mubr.msk.bf16.vlgmr.msra.gmra.mrb[12].mxu1 %vm1425_vm0, %v4461_v32 }
 0x2fe   : > { %3757 = vmatprep.mubr.msk.bf16.mxu1 %vm4125_vm15, %v4124_v27 }
 0x3c0   : > { %v1639_v51 = vpop.f32.mrb[4].mxu1 }
 0x3c1   : > { %v1645_v52 = vsel %vm1401_vm2, %v1639_v51, -1e+30  ;;  %v3717_v53 = vpop.f32.mrb[5].mxu1 }
 0x3c2   : > { %v1642_v54 = vpop.f32.mrb[6].mxu1  ;;  %v1646_v55 = vsel %vm1598_vm1, %v1645_v52, -inf }
 0x3c3   : > { %1647 = vmax.xlane.f32.xlu0 %v1646_v55  ;;  %v3718_v56 = vpop.f32.mrb[7].mxu1 }
 0x3c8   : > { %v1767_v16 = vpop.f32.mrb[8].mxu1 }
 0x3c9   : > { %v3731_v17 = vpop.f32.mrb[9].mxu1  ;;  %v1768_v30 = vadd.f32 %v3464_v25, %v1767_v16 }
 0x3ca   : > { %v1770_v18 = vpop.f32.mrb[10].mxu1 }
 0x3cb   : > { %v3732_v19 = vpop.f32.mrb[11].mxu1  ;;  %v1773_v37 = vmul.f32 0.35355338, %v1768_v30 }
 0x3cd   : > { %v1904_v38 = vpack.c.bf16 %v1773_v37, %v1773_v37 }
 0x3d0   : > { %v1898_v48 = vpop.f32.mrb[12].mxu1 }
 0x3d1   : > { %v1899_v49 = vadd.f32 %v3482_v47, %v1898_v48  ;;  %v3747_v50 = vpop.f32.mrb[13].mxu1 }
 0x3d2   : > { %v1901_v51 = vpop.f32.mrb[14].mxu1 }
 0x3d3   : > { %v3748_v53 = vpop.f32.mrb[15].mxu1 }
 0x450   : > { %v1648_v57 = vpop.xlane.xlu0 %1647 }
 0x451   : > { %v1649_v58 = vsub.f32 %v1645_v52, %v1648_v57  ;;  %v1965_v52 = vpack.c.bf16 %v1899_v49, %v1899_v49 }
 0x453   : > { %v1650_v59 = vmul.f32 1.442695, %v1649_v58  ;;  %v1970_v54 = vsel %vm1662_vm3, %v1965_v52, 0 }
 0x454   : > { %3756 = vmatpush3.bf16.msra.mxu1 %v1970_v54 }
 0x455   : > { %4002 = vpow2.f32 %v1650_v59  ;;  %3767 = vmatprep.subr.bf16.mxu1 %v4124_v27 }
 0x45f   : > { %v4003_v60 = vpop.eup %4002 }
 0x460   : > { %v1652_v61 = vsel %vm1598_vm1, %v4003_v60, 0.0 }
 0x461   : > { %1653 = vadd.xlane.f32.xlu0 %v1652_v61 }
 0x4ee   : > { %v1654_v10 = vpop.xlane.xlu0 %1653 }
 0x4ef   : > { %4004 = vrcp.f32 %v1654_v10  ;;  %v3986_v10 = vld [vmem:[%s4886_s20 + $0x20] sm:$0xff]  }
 0x4f9   : > { %v4005_v11 = vpop.eup %4004 }
 0x4fa   : > { %v1656_v12 = vmul.f32 %v4005_v11, %v4003_v60  ;;  %v3488_v60 = vld [vmem:[%s4369_s19 + $0x4] sm:$0xf] }
 0x4fb   : > { %v2019_v61 = vsel %vm1662_vm3, %v3488_v60, 0  ;;  %v3514_v60 = vld [vmem:[%s4363_s5 + $0x2] ss:$0 sm:$0xff]  ;;  %s4889_s5 = scalar_lea.vmem %s4801_s10, %s4328_s28 }
 0x4fc   : > { %v1657_v14 = vpack.c.bf16 %v1656_v12, %v1656_v12 }
 0x4fe   : > { %3722 = vmatmul.mubr.msk.bf16.vlgmr.msra.gmra.mrb[8].mxu0 %vm1598_vm1, %v1657_v14 }
 0x4ff   : > { %3734 = vmatpush3.bf16.msra.mxu0 %v3978_v13  ;;  %3737 = vmatprep.mubr.msk.bf16.mxu0 %vm4125_vm15, %v4124_v27 }
 0x500   : > { %3735 = vmatprep.subr.bf16.mxu0 %v4124_v27 }
 0x503   : > { %3736 = vmatpush3.bf16.msra.mxu0 %v3980_v15  ;;  %v3987_v15 = vld [vmem:[%s4886_s20 + $0x28] sm:$0xff]  }
 0x504   : > { %3749 = vmatprep.subr.bf16.mxu0 %v4124_v27 }
 0x506   : > { %3738 = vmatmul.mubr.msk.bf16.vlgmr.msra.gmra.mrb[12].mxu0 %vm1425_vm0, %v4461_v32 }
 0x507   : > { %3751 = vmatprep.mubr.msk.bf16.mxu0 %vm4125_vm15, %v4124_v27 }
 0x5d1   : > { %v4517_v20 = vpop.f32.mrb[8].mxu0 }
 0x5d2   : > { %v3723_v21 = vpop.f32.mrb[9].mxu0  ;;  %v1706_v7 = vpack.c.bf16 %v4517_v20, %v4517_v20  ;;  %v3505_v20 = vld [vmem:[%s4887_s3 + $0x2] ss:$0 sm:$0xff] }
 0x5d3   : > { %v1703_v22 = vpop.f32.mrb[10].mxu0 }
 0x5d4   : > { %v3724_v23 = vpop.f32.mrb[11].mxu0 }
 0x5d9   : > { %v1833_v26 = vpop.f32.mrb[12].mxu0 }
 0x5da   : > { %v1834_v28 = vadd.f32 %v3473_v24, %v1833_v26  ;;  %v3739_v29 = vpop.f32.mrb[13].mxu0 }
 0x5db   : > { %v1836_v33 = vpop.f32.mrb[14].mxu0 }
 0x5dc   : > { %v1905_v34 = vpack.c.bf16 %v1834_v28, %v1834_v28  ;;  %v3740_v35 = vpop.f32.mrb[15].mxu0 }
 0x5de   : > { %v1910_v36 = vsel %vm1598_vm1, %v1905_v34, 0 }
 0x5df   : > { %3750 = vmatpush3.bf16.xpose.msra.mxu0 %v1910_v36  ;;  %v3496_v36 = vld [vmem:[%s4888_s11 + $0x2] ss:$0 sm:$0xff] }
 0x5e0   : > { %3761 = vmatprep.subr.bf16.mxu0 %v4124_v27 }
 0x5e6   : > { %3752 = vmatmul.mubr.msk.bf16.vlgmr.msra.gmra.mrb[16].mxu0 %vm1598_vm1, %v1904_v38 }
 0x5e7   : > { %3763 = vmatprep.mubr.msk.bf16.mxu0 %vm4125_vm15, %v4124_v27  ;;  %3762 = vmatpush3.bf16.msra.mxu0 %v2019_v61 }
 0x5e8   : > { %3773 = vmatprep.subr.bf16.mxu0 %v4124_v27 }
 0x6b9   : > { %v1946_v41 = vpop.f32.mrb[16].mxu0 }
 0x6ba   : > { %v1952_v42 = vsel %vm1401_vm2, %v1946_v41, -1e+30  ;;  %v3753_v43 = vpop.f32.mrb[17].mxu0 }
 0x6bb   : > { %v1949_v44 = vpop.f32.mrb[18].mxu0  ;;  %v1953_v45 = vsel %vm1598_vm1, %v1952_v42, -inf }
 0x6bc   : > { %1954 = vmax.xlane.f32.xlu1 %v1953_v45  ;;  %v3754_v46 = vpop.f32.mrb[19].mxu0  ;;  %v3988_v44 = vld [vmem:[%s4358_s18 + $0x20] sm:$0xff]   ;;  %v3989_v45 = vld [vmem:[%s4358_s18 + $0x28] sm:$0xff]  }
 0x749   : > { %v1955_v55 = vpop.xlane.xlu1 %1954 }
 0x74a   : > { %v1956_v56 = vsub.f32 %v1952_v42, %v1955_v55 }
 0x74c   : > { %v1957_v57 = vmul.f32 1.442695, %v1956_v56 }
 0x74e   : > { %4006 = vpow2.f32 %v1957_v57 }
 0x758   : > { %v4007_v58 = vpop.eup %4006 }
 0x759   : > { %v1959_v59 = vsel %vm1598_vm1, %v4007_v58, 0.0 }
 0x75a   : > { %1960 = vadd.xlane.f32.xlu1 %v1959_v59 }
 0x7e7   : > { %v1961_v62 = vpop.xlane.xlu1 %1960 }
 0x7e8   : > { %4008 = vrcp.f32 %v1961_v62 }
 0x7f2   : > { %v4009_v63 = vpop.eup %4008 }
 0x7f3   : > { %v1963_v3 = vmul.f32 %v4009_v63, %v4007_v58 }
 0x7f5   : > { %v1964_v4 = vpack.c.bf16 %v1963_v3, %v1963_v3  ;;  %v3520_v3 = vld [vmem:[%s4369_s19 + $0x8] sm:$0xf] }
 0x7f7   : > { %3758 = vmatmul.mubr.msk.bf16.vlgmr.msra.gmra.mrb[16].mxu1 %vm1598_vm1, %v1964_v4  ;;  %v2418_v4 = vsel %vm1662_vm3, %v3520_v3, 0 }
 0x7f8   : > { %3768 = vmatpush3.bf16.msra.mxu1 %v2065_v5  ;;  %3769 = vmatprep.mubr.msk.bf16.mxu1 %vm4125_vm15, %v4124_v27 }
 0x7f9   : > { %3781 = vmatprep.subr.bf16.mxu1 %v4124_v27 }
 0x7ff   : > { %3770 = vmatmul.mubr.msk.bf16.vlgmr.msra.gmra.mrb[20].mxu1 %vm1598_vm1, %v1706_v7 }
 0x800   : > { %3782 = vmatpush3.bf16.msra.mxu1 %v3984_v6  ;;  %3785 = vmatprep.mubr.msk.bf16.mxu1 %vm4125_vm15, %v4124_v27 }
 0x801   : > { %3783 = vmatprep.subr.bf16.mxu1 %v4124_v27 }
 0x804   : > { %3784 = vmatpush3.bf16.msra.mxu1 %v3985_v8 }
 0x805   : > { %3797 = vmatprep.subr.bf16.mxu1 %v4124_v27 }
 0x807   : > { %3786 = vmatmul.mubr.msk.bf16.vlgmr.msra.gmra.mrb[24].mxu1 %vm1425_vm0, %v4461_v32 }
 0x808   : > { %3799 = vmatprep.mubr.msk.bf16.mxu1 %vm4125_vm15, %v4124_v27 }
 0x8ca   : > { %v2006_v9 = vpop.f32.mrb[16].mxu1 }
 0x8cb   : > { %v2012_v11 = vpack.c.bf16 %v2006_v9, %v2006_v9  ;;  %v3759_v12 = vpop.f32.mrb[17].mxu1  ;;  %v3991_v9 = vld [vmem:[%s4886_s20 + $0x30] sm:$0xff]  }
 0x8cc   : > { %v2009_v13 = vpop.f32.mrb[18].mxu1  ;;  %v3990_v12 = vld [vmem:[%s4885_s22 + $0x30] sm:$0xff]  }
 0x8cd   : > { %v3760_v14 = vpop.f32.mrb[19].mxu1  ;;  %3764 = vmatmul.mubr.msk.bf16.vlgmr.msra.gmra.mrb[20].mxu0 %vm1598_vm1, %v2012_v11 }
 0x8ce   : > { %3774 = vmatpush3.bf16.msra.mxu0 %v3986_v10  ;;  %3777 = vmatprep.mubr.msk.bf16.mxu0 %vm4125_vm15, %v4124_v27  ;;  %v3993_v10 = vld [vmem:[%s4886_s20 + $0x38] sm:$0xff]  }
 0x8cf   : > { %3775 = vmatprep.subr.bf16.mxu0 %v4124_v27 }
 0x8d2   : > { %v2101_v16 = vpop.f32.mrb[20].mxu1  ;;  %3776 = vmatpush3.bf16.msra.mxu0 %v3987_v15 }
 0x8d3   : > { %v3771_v17 = vpop.f32.mrb[21].mxu1  ;;  %3789 = vmatprep.subr.bf16.mxu0 %v4124_v27 }
 0x8d4   : > { %v2104_v18 = vpop.f32.mrb[22].mxu1  ;;  %v3992_v17 = vld [vmem:[%s4885_s22 + $0x38] sm:$0xff]  }
 0x8d5   : > { %v3772_v19 = vpop.f32.mrb[23].mxu1  ;;  %3778 = vmatmul.mubr.msk.bf16.vlgmr.msra.gmra.mrb[24].mxu0 %vm1425_vm0, %v4461_v32 }
 0x8d6   : > { %3793 = vmatprep.mubr.msk.bf16.mxu0 %vm4125_vm15, %v4124_v27  ;;  %3790 = vmatpush3.bf16.msra.mxu0 %v3988_v44 }
 0x8d7   : > { %3791 = vmatprep.subr.bf16.mxu0 %v4124_v27 }
 0x8da   : > { %v2232_v21 = vpop.f32.mrb[24].mxu1  ;;  %3792 = vmatpush3.bf16.msra.mxu0 %v3989_v45 }
 0x8db   : > { %v2233_v22 = vadd.f32 %v3505_v20, %v2232_v21  ;;  %v3787_v23 = vpop.f32.mrb[25].mxu1  ;;  %3803 = vmatprep.subr.bf16.mxu0 %v4124_v27 }
 0x8dc   : > { %v2235_v24 = vpop.f32.mrb[26].mxu1 }
 0x8dd   : > { %v2304_v25 = vpack.c.bf16 %v2233_v22, %v2233_v22  ;;  %v3788_v26 = vpop.f32.mrb[27].mxu1  ;;  %3794 = vmatmul.mubr.msk.bf16.vlgmr.msra.gmra.mrb[28].mxu0 %vm1425_vm0, %v4461_v32 }
 0x8de   : > { %3805 = vmatprep.mubr.msk.bf16.mxu0 %vm4125_vm15, %v4124_v27 }
 0x8df   : > { %v2309_v28 = vsel %vm1598_vm1, %v2304_v25, 0 }
 0x8e0   : > { %3798 = vmatpush3.bf16.xpose.msra.mxu1 %v2309_v28  ;;  %v3536_v28 = vld [vmem:[%s4887_s3 + $0x3] ss:$0 sm:$0xff] }
 0x8e1   : > { %3809 = vmatprep.subr.bf16.mxu1 %v4124_v27 }
 0x9a0   : > { %v2055_v29 = vpop.f32.mrb[20].mxu0 }
 0x9a1   : > { %v4578_v30 = vadd.f32 %v2101_v16, %v2055_v29  ;;  %v3765_v33 = vpop.f32.mrb[21].mxu0  ;;  %v3527_v29 = vld [vmem:[%s4888_s11 + $0x3] ss:$0 sm:$0xff] }
 0x9a2   : > { %v2058_v34 = vpop.f32.mrb[22].mxu0 }
 0x9a3   : > { %v3766_v35 = vpop.f32.mrb[23].mxu0 }
 0x9a8   : > { %v2166_v37 = vpop.f32.mrb[24].mxu0 }
 0x9a9   : > { %v2167_v38 = vadd.f32 %v3496_v36, %v2166_v37  ;;  %v3779_v39 = vpop.f32.mrb[25].mxu0 }
 0x9aa   : > { %v2169_v40 = vpop.f32.mrb[26].mxu0 }
 0x9ab   : > { %v2172_v41 = vmul.f32 0.35355338, %v2167_v38  ;;  %v3780_v42 = vpop.f32.mrb[27].mxu0 }
 0x9ac   : > { %v3994_v42 = vld [vmem:[%s4358_s18 + $0x30] sm:$0xff]  }
 0x9ad   : > { %v2303_v43 = vpack.c.bf16 %v2172_v41, %v2172_v41 }
 0x9af   : > { %3800 = vmatmul.mubr.msk.bf16.vlgmr.msra.gmra.mrb[28].mxu1 %vm1598_vm1, %v2303_v43  ;;  %v3995_v43 = vld [vmem:[%s4358_s18 + $0x38] sm:$0xff]   ;;  %s4894_s18 = sld [smem:[#allocation8_spill]] }
 0x9b0   : > { %3811 = vmatprep.mubr.msk.bf16.mxu1 %vm4125_vm15, %v4124_v27  ;;  %v2297_v57 = vpop.f32.mrb[28].mxu0  ;;  %3810 = vmatpush3.bf16.msra.mxu1 %v2418_v4 }
 0x9b1   : > { %v3795_v58 = vpop.f32.mrb[29].mxu0  ;;  %v2298_v62 = vadd.f32 %v3514_v60, %v2297_v57  ;;  %3823 = vmatprep.subr.bf16.mxu1 %v4124_v27  ;;  %v3551_v60 = vld [vmem:[%s4369_s19 + $0xc] sm:$0xf] }
 0x9b2   : > { %v2300_v59 = vpop.f32.mrb[30].mxu0 }
 0x9b3   : > { %v3796_v61 = vpop.f32.mrb[31].mxu0  ;;  %v2364_v63 = vpack.c.bf16 %v2298_v62, %v2298_v62 }
 0x9b4   : > { %v2772_v61 = vsel %vm1662_vm3, %v3551_v60, 0 }
 0x9b5   : > { %v2369_v0 = vsel %vm1662_vm3, %v2364_v63, 0  ;;  %p3568_p1 = scmp.ne.s32.totalorder %s4894_s18, 1 }
 0x9b6   : > { %3804 = vmatpush3.bf16.msra.mxu0 %v2369_v0  ;;  %vm3051_vm5 = vcmask (!%p3568_p1), 261127   ;;  %vm4127_vm6 = vmmov (!%p3568_p1), 0   ;;  %s4897_s21 = sld [smem:[#allocation36_spill]] (!%p3568_p1)  ;;  %s4898_s22 = sld [smem:[#allocation38_spill]] (!%p3568_p1)  ;;  %vm3158_vm7 = vcmask (!%p3568_p1), 24576  }
 0x9b7   : > { %3815 = vmatprep.subr.bf16.mxu0 %v4124_v27 }
 0xa82   : > { %v2345_v46 = vpop.f32.mrb[28].mxu1 }
 0xa83   : > { %v2351_v47 = vsel %vm1401_vm2, %v2345_v46, -1e+30  ;;  %v3801_v48 = vpop.f32.mrb[29].mxu1 }
 0xa84   : > { %v2348_v49 = vpop.f32.mrb[30].mxu1  ;;  %v2352_v50 = vsel %vm1598_vm1, %v2351_v47, -inf }
 0xa85   : > { %2353 = vmax.xlane.f32.xlu0 %v2352_v50  ;;  %v3802_v51 = vpop.f32.mrb[31].mxu1 }
 0xb12   : > { %v2354_v52 = vpop.xlane.xlu0 %2353 }
 0xb13   : > { %v2355_v53 = vsub.f32 %v2351_v47, %v2354_v52 }
 0xb15   : > { %v2356_v54 = vmul.f32 1.442695, %v2355_v53 }
 0xb17   : > { %4010 = vpow2.f32 %v2356_v54 }
 0xb21   : > { %v4011_v55 = vpop.eup %4010 }
 0xb22   : > { %v2358_v56 = vsel %vm1598_vm1, %v4011_v55, 0.0 }
 0xb23   : > { %2359 = vadd.xlane.f32.xlu1 %v2358_v56 }
 0xbb0   : > { %v2360_v5 = vpop.xlane.xlu1 %2359 }
 0xbb1   : > { %4012 = vrcp.f32 %v2360_v5 }
 0xbbb   : > { %v4013_v6 = vpop.eup %4012 }
 0xbbc   : > { %v2362_v7 = vmul.f32 %v4013_v6, %v4011_v55 }
 0xbbe   : > { %v2363_v8 = vpack.c.bf16 %v2362_v7, %v2362_v7 }
 0xbc0   : > { %3806 = vmatmul.mubr.msk.bf16.vlgmr.msra.gmra.mrb[32].mxu0 %vm1598_vm1, %v2363_v8 }
 0xbc1   : > { %3819 = vmatprep.mubr.msk.bf16.mxu0 %vm4125_vm15, %v4124_v27  ;;  %3816 = vmatpush3.bf16.msra.mxu0 %v3991_v9 }
 0xbc2   : > { %3817 = vmatprep.subr.bf16.mxu0 %v4124_v27 }
 0xbc5   : > { %3818 = vmatpush3.bf16.msra.mxu0 %v3993_v10  ;;  %v3553_v10 = vld [vmem:[%s4889_s5] ss:$0 sm:$0xff] }
 0xbc6   : > { %3831 = vmatprep.subr.bf16.mxu0 %v4124_v27 }
 0xbc8   : > { %3820 = vmatmul.mubr.msk.bf16.vlgmr.msra.gmra.mrb[36].mxu0 %vm1425_vm0, %v4461_v32 }
 0xbc9   : > { %3835 = vmatprep.mubr.msk.bf16.mxu0 %vm4125_vm15, %v4124_v27  ;;  %3832 = vmatpush3.bf16.msra.mxu0 %v3994_v42 }
 0xbca   : > { %3833 = vmatprep.subr.bf16.mxu0 %v4124_v27 }
 0xbcd   : > { %3834 = vmatpush3.bf16.msra.mxu0 %v3995_v43 }
 0xbce   : > { %3845 = vmatprep.subr.bf16.mxu0 %v4124_v27 }
 0xbd0   : > { %3836 = vmatmul.mubr.msk.bf16.vlgmr.msra.gmra.mrb[40].mxu0 %vm1425_vm0, %v4461_v32 }
 0xbd1   : > { %3847 = vmatprep.mubr.msk.bf16.mxu0 %vm4125_vm15, %v4124_v27 }
 0xc93   : > { %v2405_v11 = vpop.f32.mrb[32].mxu0 }
 0xc94   : > { %v2411_v13 = vpack.c.bf16 %v2405_v11, %v2405_v11  ;;  %v3807_v14 = vpop.f32.mrb[33].mxu0 }
 0xc95   : > { %v2408_v15 = vpop.f32.mrb[34].mxu0 }
 0xc96   : > { %v3808_v16 = vpop.f32.mrb[35].mxu0  ;;  %3812 = vmatmul.mubr.msk.bf16.vlgmr.msra.gmra.mrb[32].mxu1 %vm1598_vm1, %v2411_v13 }
 0xc97   : > { %3824 = vmatpush3.bf16.msra.mxu1 %v3990_v12  ;;  %3827 = vmatprep.mubr.msk.bf16.mxu1 %vm4125_vm15, %v4124_v27 }
 0xc98   : > { %3825 = vmatprep.subr.bf16.mxu1 %v4124_v27 }
 0xc9b   : > { %3826 = vmatpush3.bf16.msra.mxu1 %v3992_v17  ;;  %v2520_v18 = vpop.f32.mrb[36].mxu0 }
 0xc9c   : > { %3839 = vmatprep.subr.bf16.mxu1 %v4124_v27  ;;  %v3821_v19 = vpop.f32.mrb[37].mxu0  ;;  %v2521_v36 = vadd.f32 %v3527_v29, %v2520_v18  ;;  %v3554_v29 = vld [vmem:[%s976_s27] ss:$0 sm:$0xff]  ;;  %s4890_s27 = scalar_lea.vmem %s4803_s12, %s4328_s28  ;;  %s4895_s28 = sld [smem:[#allocation37_spill]] (!%p3568_p1) }
 0xc9d   : > { %v2523_v20 = vpop.f32.mrb[38].mxu0 }
 0xc9e   : > { %3828 = vmatmul.mubr.msk.bf16.vlgmr.msra.gmra.mrb[36].mxu1 %vm1425_vm0, %v4461_v32  ;;  %v3822_v21 = vpop.f32.mrb[39].mxu0  ;;  %v2526_v41 = vmul.f32 0.35355338, %v2521_v36 }
 0xc9f   : > { %3841 = vmatprep.mubr.msk.bf16.mxu1 %vm4125_vm15, %v4124_v27 }
 0xca3   : > { %v2651_v54 = vpop.f32.mrb[40].mxu0 }
 0xca4   : > { %v3837_v55 = vpop.f32.mrb[41].mxu0  ;;  %v2652_v57 = vadd.f32 %v3545_v2, %v2651_v54 }
 0xca5   : > { %v2654_v1 = vpop.f32.mrb[42].mxu0  ;;  %v3560_v55 = vld [vmem:[%s4892_s24] ss:$0 sm:$0xff] }
 0xca6   : > { %v3838_v56 = vpop.f32.mrb[43].mxu0  ;;  %v2718_v58 = vpack.c.bf16 %v2652_v57, %v2652_v57 }
 0xca8   : > { %v2723_v59 = vsel %vm1662_vm3, %v2718_v58, 0 }
 0xca9   : > { %3846 = vmatpush3.bf16.msra.mxu0 %v2723_v59 }
 0xcaa   : > { %3857 = vmatprep.subr.bf16.mxu0 %v4124_v27 }
 0xd69   : > { %v2454_v22 = vpop.f32.mrb[32].mxu1 }
 0xd6a   : > { %v4626_v23 = vadd.f32 %v2454_v22, %v4578_v30  ;;  %v3813_v24 = vpop.f32.mrb[33].mxu1  ;;  %v2657_v30 = vpack.c.bf16 %v2526_v41, %v2526_v41  ;;  %v4001_v41 = vld [vmem:[%s4392_s9 + $0x18] sm:$0xff]  }
 0xd6b   : > { %v2457_v25 = vpop.f32.mrb[34].mxu1  ;;  %v3997_v24 = vld [vmem:[%s4378_s23 + $0x8] sm:$0xff]  }
 0xd6c   : > { %v3814_v26 = vpop.f32.mrb[35].mxu1 }
 0xd71   : > { %v2586_v33 = vpop.f32.mrb[36].mxu1 }
 0xd72   : > { %v2587_v34 = vadd.f32 %v3536_v28, %v2586_v33  ;;  %v3829_v35 = vpop.f32.mrb[37].mxu1 }
 0xd73   : > { %v2589_v37 = vpop.f32.mrb[38].mxu1 }
 0xd74   : > { %v2658_v38 = vpack.c.bf16 %v2587_v34, %v2587_v34  ;;  %v3830_v39 = vpop.f32.mrb[39].mxu1  ;;  %v3555_v34 = vld [vmem:[%s979_s4] ss:$0 sm:$0xff] }
 0xd75   : > { %v3999_v39 = vld [vmem:[%s4392_s9 + $0x8] sm:$0xff]  }
 0xd76   : > { %v2663_v40 = vsel %vm1598_vm1, %v2658_v38, 0  ;;  %v3998_v38 = vld [vmem:[%s4392_s9] sm:$0xff]  }
 0xd77   : > { %3840 = vmatpush3.bf16.xpose.msra.mxu1 %v2663_v40  ;;  %v4000_v40 = vld [vmem:[%s4392_s9 + $0x10] sm:$0xff]  }
 0xd78   : > { %3851 = vmatprep.subr.bf16.mxu1 %v4124_v27 }
 0xd7e   : > { %3842 = vmatmul.mubr.msk.bf16.vlgmr.msra.gmra.mrb[40].mxu1 %vm1598_vm1, %v2657_v30  ;;  %v3556_v30 = vld [vmem:[%s4890_s27] ss:$0 sm:$0xff]  ;;  %s4896_s27 = sld [smem:[#allocation35_spill]] (!%p3568_p1) }
 0xd7f   : > { %3853 = vmatprep.mubr.msk.bf16.mxu1 %vm4125_vm15, %v4124_v27  ;;  %3852 = vmatpush3.bf16.msra.mxu1 %v2772_v61 }
 0xd80   : > { %3865 = vmatprep.subr.bf16.mxu1 %v4124_v27 }
 0xe51   : > { %v2699_v44 = vpop.f32.mrb[40].mxu1 }
 0xe52   : > { %v2705_v45 = vsel %vm1401_vm2, %v2699_v44, -1e+30  ;;  %v3843_v46 = vpop.f32.mrb[41].mxu1 }
 0xe53   : > { %v2702_v47 = vpop.f32.mrb[42].mxu1  ;;  %v2706_v48 = vsel %vm1598_vm1, %v2705_v45, -inf }
 0xe54   : > { %2707 = vmax.xlane.f32.xlu0 %v2706_v48  ;;  %v3844_v49 = vpop.f32.mrb[43].mxu1 }
 0xee1   : > { %v2708_v50 = vpop.xlane.xlu0 %2707 }
 0xee2   : > { %v2709_v51 = vsub.f32 %v2705_v45, %v2708_v50 }
 0xee4   : > { %v2710_v52 = vmul.f32 1.442695, %v2709_v51 }
 0xee6   : > { %4014 = vpow2.f32 %v2710_v52 }
 0xef0   : > { %v4015_v32 = vpop.eup %4014 }
 0xef1   : > { %v2712_v53 = vsel %vm1598_vm1, %v4015_v32, 0.0 }
 0xef2   : > { %2713 = vadd.xlane.f32.xlu1 %v2712_v53 }
 0xf7f   : > { %v2714_v62 = vpop.xlane.xlu1 %2713 }
 0xf80   : > { %4016 = vrcp.f32 %v2714_v62 }
 0xf8a   : > { %v4017_v63 = vpop.eup %4016 }
 0xf8b   : > { %v2716_v0 = vmul.f32 %v4017_v63, %v4015_v32 }
 0xf8d   : > { %v2717_v3 = vpack.c.bf16 %v2716_v0, %v2716_v0 }
 0xf8f   : > { %3848 = vmatmul.mubr.msk.bf16.vlgmr.msra.gmra.mrb[44].mxu0 %vm1598_vm1, %v2717_v3 }
 0xf90   : > { %3861 = vmatprep.mubr.msk.bf16.mxu0 %vm4125_vm15, %v4124_v27 }
0x1062   : > { %v2759_v4 = vpop.f32.mrb[44].mxu0 }
0x1063   : > { %v2765_v5 = vpack.c.bf16 %v2759_v4, %v2759_v4  ;;  %v3849_v6 = vpop.f32.mrb[45].mxu0 }
0x1064   : > { %v2762_v7 = vpop.f32.mrb[46].mxu0 }
0x1065   : > { %v3850_v8 = vpop.f32.mrb[47].mxu0  ;;  %3854 = vmatmul.mubr.msk.bf16.vlgmr.msra.gmra.mrb[44].mxu1 %vm1598_vm1, %v2765_v5 }
0x1066   : > { %3873 = vmatprep.mubr.msk.bf16.mxu1 %vm4125_vm15, %v4124_v27  ;;  %3866 = vmatpush3.bf16.msra.mxu1 %v3998_v38  ;;  %v3566_v8 = vld [vmem:[%s982_s29] ss:$0 sm:$0xff] }
0x1067   : > { %3867 = vmatprep.subr.bf16.mxu1 %v4124_v27 }
0x106a   : > { %3868 = vmatpush3.bf16.msra.mxu1 %v3999_v39 }
0x106b   : > { %3869 = vmatprep.subr.bf16.mxu1 %v4124_v27 }
0x106e   : > { %3870 = vmatpush3.bf16.msra.mxu1 %v4000_v40  ;;  %v3083_v40 = vld [vmem:[%s4898_s22] sm:$0x1] (!%p3568_p1) }
0x106f   : > { %3871 = vmatprep.subr.bf16.mxu1 %v4124_v27 }
0x1072   : > { %3872 = vmatpush3.bf16.msra.mxu1 %v4001_v41 }
0x1138   : > { %v2808_v9 = vpop.f32.mrb[44].mxu1 }
0x1139   : > { %v2814_v11 = vadd.f32 %v2808_v9, %v4626_v23  ;;  %v3855_v12 = vpop.f32.mrb[45].mxu1  ;;  %v3996_v23 = vld [vmem:[%s4378_s23] sm:$0xff]  }
0x113a   : > { %v2811_v13 = vpop.f32.mrb[46].mxu1  ;;  %3858 = vmatpush3.bf16.msra.mxu0 %v3996_v23 }
0x113b   : > { %v2822_v14 = vadd.f32 %v3553_v10, %v2814_v11  ;;  %v3856_v15 = vpop.f32.mrb[47].mxu1  ;;  %3859 = vmatprep.subr.bf16.mxu0 %v4124_v27  ;;  %v3567_v10 = vld [vmem:[%s985_s1] ss:$0 sm:$0xff] }
0x113d   : > { %v2823_v16 = vadd.f32 %v2822_v14, %v4455_v31 }
0x113e   : > { %3860 = vmatpush3.bf16.msra.mxu0 %v3997_v24  ;;  %v3082_v24 = vld [vmem:[%s4895_s28 + $0x18] sm:$0xff] (!%p3568_p1) }
0x113f   : > { %v2826_v17 = vsel %vm1425_vm0, %v2823_v16, 0.0 }
0x1140   : > { %2827 = vadd.xlane.f32.xlu0 %v2826_v17 }
0x11cd   : > { %v2828_v18 = vpop.xlane.xlu0 %2827 }
0x11ce   : > { %v2830_v19 = vmul.f32 0.03125, %v2828_v18 }
0x11d0   : > { %v2831_v20 = vsub.f32 %v2823_v16, %v2830_v19  ;;  %v3079_v19 = vld [vmem:[%s4895_s28] sm:$0xff] (!%p3568_p1) }
0x11d2   : > { %v2832_v21 = vmul.f32 %v2831_v20, %v2831_v20 }
0x11d4   : > { %v2833_v22 = vsel %vm1425_vm0, %v2832_v21, 0.0  ;;  %v3081_v21 = vld [vmem:[%s4895_s28 + $0x10] sm:$0xff] (!%p3568_p1) }
0x11d5   : > { %2834 = vadd.xlane.f32.xlu1 %v2833_v22  ;;  %v4126_v22 = vmov (!%p3568_p1), 0.0|0.0  }
0x11d6   : > { %3888 = vmatprep.subr.bf16.mxu0 (!%p3568_p1), %v4126_v22 }
0x1262   : > { %v2835_v31 = vpop.xlane.xlu1 %2834 }
0x1263   : > { %v2836_v25 = vmul.f32 0.03125, %v2835_v31  ;;  %v4128_v31 = vmov (!%p3568_p1), 0.0  }
0x1265   : > { %v2837_v26 = vadd.f32 1e-05, %v2836_v25  ;;  %v3892_v25 = vpack.c.bf16 (!%p3568_p1), %v3082_v24, %v3081_v21 }
0x1267   : > { %4018 = vrsqrt.f32 %v2837_v26 }
0x1271   : > { %v4019_v28 = vpop.eup %4018 }
0x1272   : > { %v2839_v33 = vmul.f32 %v4019_v28, %v2831_v20  ;;  %v3080_v20 = vld [vmem:[%s4895_s28 + $0x8] sm:$0xff] (!%p3568_p1) }
0x1273   : > { %v3889_v23 = vpack.c.bf16 (!%p3568_p1), %v3080_v20, %v3079_v19 }
0x1274   : > { %v2846_v35 = vmul.f32 %v3554_v29, %v2839_v33 }
0x1276   : > { %v2853_v36 = vadd.f32 %v3555_v34, %v2846_v35  ;;  %v3569_v34 = vld [vmem:[%s4896_s27] ss:$0 sm:$0xff] (!%p3568_p1) }
0x1278   : > { %v2854_v37 = vpack.c.bf16 %v2853_v36, %v2853_v36 }
0x127a   : > { %3862 = vmatmul.mubr.msk.bf16.vlgmr.msra.gmra.mrb[48].mxu0 %vm1425_vm0, %v2854_v37 }
0x127b   : > { %3885 = vmatprep.mubr.msk.f32.mxu0 (!%p3568_p1), %vm4127_vm6, %v4128_v31  ;;  %3890 = vmatpush3.bf16.msra.mxu0 (!%p3568_p1), %v3889_v23 }
0x127c   : > { %3891 = vmatprep.subr.bf16.mxu0 (!%p3568_p1), %v4126_v22 }
0x127f   : > { %3893 = vmatpush3.bf16.msra.mxu0 (!%p3568_p1), %v3892_v25 }
0x134d   : > { %v2915_v42 = vpop.f32.mrb[48].mxu0 }
0x134e   : > { %v2916_v43 = vadd.f32 %v3556_v30, %v2915_v42  ;;  %v3863_v44 = vpop.f32.mrb[49].mxu0 }
0x134f   : > { %v2918_v45 = vpop.f32.mrb[50].mxu0 }
0x1350   : > { %v2922_v46 = vmul.f32 0.044715, %v2916_v43  ;;  %v3864_v47 = vpop.f32.mrb[51].mxu0  ;;  %v2921_v27 = vmul.f32 0.5, %v2916_v43 }
0x1352   : > { %v2923_v48 = vmul.f32 %v2922_v46, %v2916_v43 }
0x1354   : > { %v2924_v49 = vmul.f32 %v2923_v48, %v2916_v43 }
0x1356   : > { %v2925_v50 = vadd.f32 %v2924_v49, %v2916_v43 }
0x1358   : > { %v2926_v51 = vmul.f32 0.7978846, %v2925_v50 }
0x135a   : > { %4020 = vtanh.f32 %v2926_v51 }
0x1364   : > { %v4021_v52 = vpop.eup %4020 }
0x1365   : > { %v2928_v32 = vadd.f32 1.0, %v4021_v52 }
0x1367   : > { %v2929_v53 = vmul.f32 %v2928_v32, %v2921_v27 }
0x1369   : > { %v2930_v54 = vpack.c.bf16 %v2929_v53, %v2929_v53 }
0x136b   : > { %3874 = vmatmul.mubr.msk.bf16.vlgmr.msra.gmra.mrb[48].mxu1 %vm2970_vm4, %v2930_v54 }
0x143e   : > { %v3008_v1 = vpop.f32.mrb[48].mxu1 }
0x143f   : > { %v3009_v2 = vadd.f32 %v3560_v55, %v3008_v1  ;;  %v3875_v56 = vpop.f32.mrb[49].mxu1 }
0x1440   : > { %v3011_v57 = vpop.f32.mrb[50].mxu1 }
0x1441   : > { %v3876_v58 = vpop.f32.mrb[51].mxu1  ;;  %v3014_v59 = vadd.f32 %v3009_v2, %v2853_v36  ;;  %v3570_v36 = vld [vmem:[%s4897_s21] ss:$0 sm:$0xff] (!%p3568_p1) }
0x1443   : > { %v3017_v60 = vsel %vm1425_vm0, %v3014_v59, 0.0 }
0x1444   : > { %3018 = vadd.xlane.f32.xlu0 %v3017_v60 }
0x14d1   : > { %v3019_v61 = vpop.xlane.xlu0 %3018 }
0x14d2   : > { %v3020_v62 = vmul.f32 0.03125, %v3019_v61 }
0x14d4   : > { %v3021_v63 = vsub.f32 %v3014_v59, %v3020_v62 }
0x14d6   : > { %v3022_v0 = vmul.f32 %v3021_v63, %v3021_v63 }
0x14d8   : > { %v3023_v3 = vsel %vm1425_vm0, %v3022_v0, 0.0 }
0x14d9   : > { %3024 = vadd.xlane.f32.xlu1 %v3023_v3 }
0x1566   : > { %v3025_v4 = vpop.xlane.xlu1 %3024 }
0x1567   : > { %v3026_v5 = vmul.f32 0.03125, %v3025_v4 }
0x1569   : > { %v3027_v6 = vadd.f32 1e-05, %v3026_v5 }
0x156b   : > { %4022 = vrsqrt.f32 %v3027_v6 }
0x1575   : > { %v4023_v7 = vpop.eup %4022 }
0x1576   : > { %v3029_v9 = vmul.f32 %v4023_v7, %v3021_v63  ;;  %3048 = sbr.rel (%p3568_p1) target bundleno = 6030 (0x178e), region = 120 }
0x1578   : > { %v3036_v11 = vmul.f32 %v3566_v8, %v3029_v9 }
0x157a   : > { %v3043_v12 = vadd.f32 %v3567_v10, %v3036_v11 }
0x157c   : > { %3044 = vst.msk [vmem:[#allocation2] sm:$0xff] %vm1425_vm0, %v3043_v12  ;;  %v3052_v13 = vsel (!%p3568_p1), %vm3051_vm5, %v3043_v12, 0.0 }
0x157d   : > { %3053 = vadd.xlane.f32.xlu0 %v3052_v13 }
0x160a   : > { %v3054_v14 = vpop.xlane.xlu0 %3053 }
0x160b   : > { %v3055_v15 = vmul.f32 0.03125, %v3054_v14 }
0x160d   : > { %v3056_v16 = vsub.f32 %v3043_v12, %v3055_v15 }
0x160f   : > { %v3057_v17 = vmul.f32 %v3056_v16, %v3056_v16 }
0x1611   : > { %v3058_v18 = vsel %vm3051_vm5, %v3057_v17, 0.0 }
0x1612   : > { %3059 = vadd.xlane.f32.xlu0 %v3058_v18 }
0x169f   : > { %v3060_v26 = vpop.xlane.xlu0 %3059 }
0x16a0   : > { %v3061_v28 = vmul.f32 0.03125, %v3060_v26 }
0x16a2   : > { %v3062_v29 = vadd.f32 1e-05, %v3061_v28 }
0x16a4   : > { %4024 = vrsqrt.f32 %v3062_v29 }
0x16ae   : > { %v4025_v33 = vpop.eup %4024 }
0x16af   : > { %v3064_v35 = vmul.f32 %v4025_v33, %v3056_v16 }
0x16b1   : > { %v3071_v37 = vmul.f32 %v3569_v34, %v3064_v35 }
0x16b3   : > { %v3078_v38 = vadd.f32 %v3570_v36, %v3071_v37 }
0x16b5   : > { %v3085_v39 = vrot.slane %v3078_v38, 7 }
0x16b7   : > { %3886 = vmatmul.mubr.msk.f32.vlgmr.msra.gmra.mrb[0].mxu0 %vm1425_vm0, %v3085_v39 }
0x178a   : > { %v3154_v41 = vpop.f32.mrb[0].mxu0 }
0x178b   : > { %v3155_v30 = vadd.f32 %v3154_v41, %v3083_v40  ;;  %v3887_v42 = vpop.f32.mrb[1].mxu0 }
0x178d   : > { %3159 = vst.msk [vmem:[%s4412_s8] sm:$0x1] %vm3158_vm7, %v3155_v30 }
0x178e PF: > { %s4899_s20 = sld [smem:[#allocation9_spill]]  ;;  %s4901_s19 = sld [smem:[#allocation39_spill]] }
0x178f   : > { %s3173_s5 = sshll.u32 %s4412_s8, 4  ;;  %s4902_s14 = sand.u32 1, %s4096_s30   ;;  %s3174_s5 = int_to_ptr.vmem [resolvable:$true] %s3173_s5 }
0x1790   : > { %s3161_s26 = scalar_lea.sflag [#allocation4], %s4902_s14  ;;  %s4026_s0 = scalar_lea.vmem %s3174_s5, 16 }
0x1791   : > { %p4027_p2 = scmp.ne.s32.totalorder %s3174_s5, %s4026_s0  ;;  %s4129_s6 = smov [#allocation3]  }
0x1792   : > { %s4030_s4 = sshll.u32 %s4129_s6, 4  ;;  %s4031_s4 = int_to_ptr.vmem [resolvable:$false] %s4030_s4 }
0x1793   : > { %p4028_p4 = pnand %p4027_p2, %p4299_p3  ;;  %s4032_s23 = scalar_lea.vmem %s4031_s4, 32 }
0x1794   : > { %s3572_s11 = sshll.u32 %s4899_s20, 4  ;;  %p4033_p6 = scmp.lt.s32.totalorder %s3174_s5, %s4031_s4 }
0x1795   : > { %s4741_s1 = scalar_lea.hbm %s4901_s19, %s3572_s11  ;;  %p4029_p5 = pneg %p4028_p4 }
0x1796   : > { %p4034_p7 = scmp.lt.s32.totalorder %s4032_s23, %s4026_s0 }
0x1798   : > { %p4035_p8 = por %p4034_p7, %p4033_p6 }
0x179a   : > { %p4036_p10 = pnand %p4035_p8, %p4029_p5 }
0x179c   : > { %4039 = shalt.err (!%p4036_p10)
}
0x179d   : > { %s4040_s8 = scalar_lea.hbm %s4741_s1, 16  ;;  %s4044_s2 = scalar_lea.hbm %s4901_s19, 32 }
0x179e   : > { %p4041_p11 = scmp.ne.s32.totalorder %s4741_s1, %s4040_s8  ;;  %p4045_p0 = scmp.lt.u32.totalorder %s4741_s1, %s4901_s19 }
0x179f   : > { %p4046_p1 = scmp.lt.u32.totalorder %s4044_s2, %s4040_s8  ;;  %p4048_p4 = scmp.lt.u32.totalorder %s4040_s8, %s4741_s1 }
0x17a0   : > { %p4042_p12 = pnand %p4041_p11, %p4299_p3 }
0x17a1   : > { %p4047_p2 = por %p4046_p1, %p4045_p0 }
0x17a2   : > { %p4043_p13 = pneg %p4042_p12 }
0x17a3   : > { %p4049_p5 = por %p4048_p4, %p4047_p2 }
0x17a5   : > { %p4050_p6 = pnand %p4049_p5, %p4043_p13 }
0x17a7   : > { %4053 = shalt.err (!%p4050_p6)
}
0x17a8   : > { %3894 = dma.vmem_to_hbm [thread:$0]  (%p4299_p3), %s3174_s5, 16, %s4741_s1, %s3161_s26  }
0x17a9 PF: > { %s4903_s25 = sld [smem:[#allocation12_spill]]  ;;  %s4904_s22 = sld [smem:[#allocation6_spill]] }
0x17af   : > { %p3900_p7 = scmp.ge.s32.totalorder %s4903_s25, 2  ;;  %s3185_s11 = sand.u32 1, %s4904_s22  }
0x17b0   : > { %s3186_s18 = scalar_lea.sflag [#allocation4], %s3185_s11 }
0x17b1   : > { %p3897_p8 = pnand %p3900_p7, %p4309_p9 }
0x17b3   : > { %4087 = dma.done.wait (!%p3897_p8), %s3186_s18, 16  }
0x17b4   : > { %4089 = vsyncadd (!%p3897_p8), %s3186_s18, 4294967280  ;;  %s36_s2 = sadd.s32 1, %s4903_s25   ;;  %s4906_s29 = sld [smem:[#allocation7_spill]] }
0x17b5   : > { %p33_p10 = scmp.ge.s32.totalorder %s36_s2, 6   ;;  %s4907_s24 = sld [smem:[#allocation17_spill]] }
0x17b6   : > { %s4908_s25 = sld [smem:[#allocation10_spill]]  ;;  %s4909_s5 = sld [smem:[#allocation11_spill]] }
0x17b7   : > { %s4910_s1 = sld [smem:[#allocation13_spill]]  ;;  %s4911_s26 = sld [smem:[#allocation15_spill]] }
0x17b8   : > { %s4912_s4 = smov %s4096_s30  ;;  %35 = sbr.rel (!%p33_p10) target bundleno = 24 (0x18), region = 226 }
0x17ba   : > { %s4913_s30 = smov %s4906_s29 }
0x17bf   :  { %3190 = vsyncpa [#allocation4], 1 }
0x17c0   :  { %3192 = vsyncpa [#allocation4 + $0x1], 1 }

</bundles_post_ra>
